<compile_context>
chip_gen: v5e
topology: v5e:2x2
jax: 0.10.0
libtpu: 0.0.40
codegen_flags: <defaults>
</compile_context>

<pallas_src>
import functools

import jax
import jax.numpy as jnp
from jax.experimental import pallas as pl
from jax.experimental.pallas import tpu as pltpu


# ----------------------------------------------------------------------------
# Small helpers
# ----------------------------------------------------------------------------
def _round_up(n, m):
    return ((n + m - 1) // m) * m


def _cdiv(a, b):
    return -(-a // b)


def _device_kind():
    try:
        return jax.devices()[0].device_kind.lower()
    except Exception:
        return ""


def _lane_multiple():
    # v5e MXU is 128-wide; v6e/v7x are 256-wide -> pad feature dims accordingly.
    return 128 if "v5" in _device_kind() else 256


def _num_tensorcores():
    # v7x exposes 2 TensorCores per chip; v5e/v6e have 1.
    return 2 if "v7" in _device_kind() else 1


# ----------------------------------------------------------------------------
# Kernel: fused (Linear -> ReLU) x L on one batch tile
# ----------------------------------------------------------------------------
def _fused_mlp_kernel(x_ref, *refs):
    """x_ref       : [tile_m, K0_pad]  f32 activation tile (VMEM)
       refs[2l]    : [K_pad, N_pad]    layer-l weight (MXU compute dtype, K x N)
       refs[2l+1]  : [1, N_pad]        layer-l bias (f32)
       refs[-1]    : [tile_m, NL_pad]  f32 output tile
    """
    o_ref = refs[-1]
    wb_refs = refs[:-1]
    n_layers = len(wb_refs) // 2

    x = x_ref[...].astype(jnp.float32)
    for l in range(n_layers):                        # unrolled at trace time
        w = wb_refs[2 * l][...]                      # [Kp, Np]
        b = wb_refs[2 * l + 1][...]                  # [1, Np] f32
        # Feed the MXU in the weight dtype (bf16 in production), accumulate f32.
        y = jnp.dot(x.astype(w.dtype), w, preferred_element_type=jnp.float32)
        x = jnp.maximum(y + b, 0.0)                  # bias + ReLU in f32 (VPU)
    o_ref[...] = x.astype(o_ref.dtype)


# ----------------------------------------------------------------------------
# One-time parameter preparation (do NOT call inside the jitted forward)
# ----------------------------------------------------------------------------
def prepare_params(params, in_features, *, compute_dtype=jnp.bfloat16,
                   lane_multiple=None):
    """Transpose each W to [K, N], zero-pad feature dims to the MXU lane
    multiple, and cast to the MXU compute dtype.  Runs once; the results are
    reused across every forward call (no per-call transpose/pad HBM traffic).
    Zero padding is mathematically transparent: padded input columns hit zero
    weight rows, padded output lanes get zero weight columns + zero bias, and
    relu(0)=0 propagates zeros through every layer."""
    if lane_multiple is None:
        lane_multiple = _lane_multiple()

    dims = (int(in_features),) + tuple(int(w.shape[0]) for (w, _) in params)
    pdims = tuple(_round_up(max(d, lane_multiple), lane_multiple) for d in dims)

    prepared = []
    for l, (w, b) in enumerate(params):
        N, K = w.shape
        assert K == dims[l] and N == dims[l + 1]
        Kp, Np = pdims[l], pdims[l + 1]
        wt = jnp.zeros((Kp, Np), compute_dtype).at[:K, :N].set(
            jnp.asarray(w).T.astype(compute_dtype))
        bp = jnp.zeros((1, Np), jnp.float32).at[:, :N].set(
            jnp.asarray(b).astype(jnp.float32))
        prepared.append((wt, bp))
    return prepared, dims, pdims


# ----------------------------------------------------------------------------
# Forward wrapper
# ----------------------------------------------------------------------------
def mlp_forward(x, layer_params, *, dims, pdims, tile_m=None,
                single_buffer_weights=True, num_cores=1, vmem_cap_bytes=None):
    """relu(x @ W.T + b) for every prepared layer, fused in one pallas_call."""
    B, K0 = x.shape
    n_layers = len(layer_params)
    assert n_layers >= 1 and K0 == dims[0]
    compute_dtype = layer_params[0][0].dtype

    if vmem_cap_bytes is None:
        # v7x has 64 MiB VMEM/TC; v5e/v6e have 128 MiB.
        vmem_cap_bytes = (48 << 20) if "v7" in _device_kind() else (100 << 20)

    wbuf = 1 if single_buffer_weights else 2
    w_itemsize = jnp.dtype(compute_dtype).itemsize
    weight_bytes = sum(pdims[l] * pdims[l + 1]
                       for l in range(n_layers)) * w_itemsize * wbuf
    bias_bytes = sum(8 * pdims[l + 1] * 4 for l in range(n_layers)) * wbuf

    # TODO(synk): K/N-tiled accumulator path (grid axes over N and K, f32 VMEM
    # accumulator, reduction axis last / "arbitrary") for weight stacks that do
    # not fit resident in VMEM — required for very large hidden sizes on v7x.
    if weight_bytes + bias_bytes > vmem_cap_bytes:
        raise NotImplementedError(
            "resident MLP weights exceed the VMEM budget; "
            "K/N-tiled accumulator path not implemented yet")

    # VMEM bytes per batch row: double-buffered input & output tiles plus the
    # largest f32 intermediate activation materialized inside the kernel.
    per_row_bytes = 4 * (2 * pdims[0] + 2 * pdims[-1] + 2 * max(pdims))

    if tile_m is None:
        budget_rows = (vmem_cap_bytes - weight_bytes - bias_bytes) // per_row_bytes
        tile_m = int(max(8, min(512, budget_rows, _round_up(B, 8))))
        if num_cores > 1 and _round_up(B, 8) >= 16:
            # Give each TensorCore (v7x) at least one tile of roughly equal work.
            tile_m = min(tile_m, max(8, _round_up(_cdiv(B, num_cores), 8)))
        tile_m = (tile_m // 128) * 128 if tile_m >= 128 else (tile_m // 8) * 8
        tile_m = max(8, tile_m)

    Bp = _round_up(max(B, tile_m), tile_m)
    steps = Bp // tile_m
    if num_cores > 1 and steps > 1 and steps % num_cores:
        steps = _round_up(steps, num_cores)   # even split across TensorCores
        Bp = steps * tile_m

    # Skip the padded copy when x is already aligned (saves an HBM round trip).
    if B == Bp and K0 == pdims[0] and x.dtype == jnp.float32:
        xp = x
    else:
        xp = jnp.zeros((Bp, pdims[0]), jnp.float32).at[:B, :K0].set(
            x.astype(jnp.float32))

    # Constant-index weight/bias blocks: single-buffered (they never change).
    const_kw = {"pipeline_mode": pl.Buffered(1)} if single_buffer_weights else {}

    flat_inputs = [xp]
    in_specs = [pl.BlockSpec((tile_m, pdims[0]), lambda i: (i, 0))]
    for (wt, bp) in layer_params:
        flat_inputs += [wt, bp]
        in_specs += [
            pl.BlockSpec(wt.shape, lambda i: (0, 0), **const_kw),
            pl.BlockSpec(bp.shape, lambda i: (0, 0), **const_kw),
        ]

    footprint = weight_bytes + bias_bytes + tile_m * per_row_bytes
    vmem_limit = int(min(max(2 * footprint, 32 << 20), vmem_cap_bytes))

    flops = 2 * Bp * sum(pdims[l] * pdims[l + 1] for l in range(n_layers))
    bytes_accessed = int(
        xp.size * xp.dtype.itemsize
        + sum(wt.size * wt.dtype.itemsize + bp.size * bp.dtype.itemsize
              for (wt, bp) in layer_params)
        + Bp * pdims[-1] * 4)

    out_padded = pl.pallas_call(
        _fused_mlp_kernel,
        out_shape=jax.ShapeDtypeStruct((Bp, pdims[-1]), jnp.float32),
        grid_spec=pltpu.PrefetchScalarGridSpec(
            num_scalar_prefetch=0,
            grid=(Bp // tile_m,),
            in_specs=in_specs,
            out_specs=pl.BlockSpec((tile_m, pdims[-1]), lambda i: (i, 0)),
        ),
        compiler_params=pltpu.CompilerParams(
            dimension_semantics=("parallel",),
            vmem_limit_bytes=vmem_limit,
        ),
        cost_estimate=pl.CostEstimate(
            flops=flops, transcendentals=0, bytes_accessed=bytes_accessed),
    )(*flat_inputs)

    if Bp == B and pdims[-1] == dims[-1]:
        return out_padded
    return out_padded[:B, :dims[-1]]


# ----------------------------------------------------------------------------
# Parameter init (matches nn.Linear default: U(-1/sqrt(fan_in), +1/sqrt(fan_in)))
# ----------------------------------------------------------------------------
def init_mlp_params(layer_sizes, key):
    params = []
    for i in range(len(layer_sizes) - 1):
        fan_in, fan_out = layer_sizes[i], layer_sizes[i + 1]
        key, kw, kb = jax.random.split(key, 3)
        bound = 1.0 / (fan_in ** 0.5)
        w = jax.random.uniform(kw, (fan_out, fan_in), jnp.float32,
                               minval=-bound, maxval=bound)
        b = jax.random.uniform(kb, (fan_out,), jnp.float32,
                               minval=-bound, maxval=bound)
        params.append((w, b))
    return params


def mlp_forward_ref(x, params):
    """Pure-JAX reference (PyTorch nn.Linear layout) for correctness checks."""
    for (w, b) in params:
        x = jnp.maximum(x @ w.T + b, 0.0)
    return x


# ----------------------------------------------------------------------------
# Main
# ----------------------------------------------------------------------------
if __name__ == "__main__":
    key = jax.random.PRNGKey(0)
    key, kx, kp = jax.random.split(key, 3)

    # Small shapes consistent with the module: layer_sizes = [32, 64, 16, 4]
    # -> three Linear+ReLU layers; batch of 8 feature vectors.
    layer_sizes = [32, 64, 16, 4]
    batch = 8

    x = jax.random.normal(kx, (batch, layer_sizes[0]), jnp.float32)
    params = init_mlp_params(layer_sizes, kp)
    ref = mlp_forward_ref(x, params)
    num_cores = _num_tensorcores()

    def run(compute_dtype, single_buffer):
        layer_params, dims, pdims = prepare_params(
            params, layer_sizes[0], compute_dtype=compute_dtype)
        fwd = jax.jit(functools.partial(
            mlp_forward, dims=dims, pdims=pdims,
            single_buffer_weights=single_buffer, num_cores=num_cores))
        return jax.block_until_ready(fwd(x, layer_params))

    # f32 compute path: exact check against the pure-JAX reference.
    # Falls back to default buffering if this JAX build rejects pl.Buffered(1).
    single_buffer = True
    try:
        out_f32 = run(jnp.float32, single_buffer)
    except Exception:
        single_buffer = False
        out_f32 = run(jnp.float32, single_buffer)
    assert out_f32.shape == (batch, layer_sizes[-1]), out_f32.shape
    assert jnp.allclose(out_f32, ref, atol=1e-5, rtol=1e-5), "f32 mismatch"

    # bf16-fed MXU path with f32 accumulation — the production default.
    out_bf16 = run(jnp.bfloat16, single_buffer)
    assert out_bf16.shape == (batch, layer_sizes[-1]), out_bf16.shape
    assert jnp.allclose(out_bf16, ref, atol=5e-2, rtol=5e-2), "bf16 mismatch"

    print("KERNEL_OK")
</pallas_src>

<mosaic_0001>
module attributes {stable_mosaic.version = 11 : i64} {
  func.func @_fused_mlp_kernel(%arg0: i32, %arg1: memref<8x256xf32, #tpu.memory_space<vmem>>, %arg2: memref<256x256xf32, #tpu.memory_space<vmem>>, %arg3: memref<1x256xf32, #tpu.memory_space<vmem>>, %arg4: memref<256x256xf32, #tpu.memory_space<vmem>>, %arg5: memref<1x256xf32, #tpu.memory_space<vmem>>, %arg6: memref<256x256xf32, #tpu.memory_space<vmem>>, %arg7: memref<1x256xf32, #tpu.memory_space<vmem>>, %arg8: memref<8x256xf32, #tpu.memory_space<vmem>>) attributes {dimension_semantics = [#tpu.dimension_semantics<parallel>], iteration_bounds = array<i64: 1>, scalar_prefetch = 0 : i64, scratch_operands = 0 : i64, tpu.core_type = #tpu.core_type<tc>, window_params = [{transform_indices = @transform_0, window_bounds = array<i64: 8, 256>}, {pipeline_mode = #tpu.pipeline_mode<synchronous>, transform_indices = @transform_1, window_bounds = array<i64: 256, 256>}, {pipeline_mode = #tpu.pipeline_mode<synchronous>, transform_indices = @transform_2, window_bounds = array<i64: 1, 256>}, {pipeline_mode = #tpu.pipeline_mode<synchronous>, transform_indices = @transform_3, window_bounds = array<i64: 256, 256>}, {pipeline_mode = #tpu.pipeline_mode<synchronous>, transform_indices = @transform_4, window_bounds = array<i64: 1, 256>}, {pipeline_mode = #tpu.pipeline_mode<synchronous>, transform_indices = @transform_5, window_bounds = array<i64: 256, 256>}, {pipeline_mode = #tpu.pipeline_mode<synchronous>, transform_indices = @transform_6, window_bounds = array<i64: 1, 256>}, {transform_indices = @transform_7, window_bounds = array<i64: 8, 256>}]} {
    %c0 = arith.constant 0 : index
    %c0_0 = arith.constant 0 : index
    %0 = vector.load %arg1[%c0, %c0_0] : memref<8x256xf32, #tpu.memory_space<vmem>>, vector<8x256xf32>
    %c0_1 = arith.constant 0 : index
    %c0_2 = arith.constant 0 : index
    %1 = vector.load %arg2[%c0_1, %c0_2] : memref<256x256xf32, #tpu.memory_space<vmem>>, vector<256x256xf32>
    %c0_3 = arith.constant 0 : index
    %c0_4 = arith.constant 0 : index
    %2 = vector.load %arg3[%c0_3, %c0_4] : memref<1x256xf32, #tpu.memory_space<vmem>>, vector<1x256xf32>
    %cst = arith.constant dense<0.000000e+00> : vector<8x256xf32>
    %3 = tpu.matmul %0, %1, %cst {dimension_numbers = #tpu.dot_dimension_numbers<[1], [0], [0], [1], [0, 0, 1, 1], [], []>} : vector<8x256xf32>, vector<256x256xf32>, vector<8x256xf32> -> vector<8x256xf32>
    %4 = vector.broadcast %2 : vector<1x256xf32> to vector<8x256xf32>
    %5 = arith.addf %3, %4 : vector<8x256xf32>
    %cst_5 = arith.constant 0.000000e+00 : f32
    %6 = vector.broadcast %cst_5 : f32 to vector<8x256xf32>
    %7 = arith.maximumf %5, %6 : vector<8x256xf32>
    %c0_6 = arith.constant 0 : index
    %c0_7 = arith.constant 0 : index
    %8 = vector.load %arg4[%c0_6, %c0_7] : memref<256x256xf32, #tpu.memory_space<vmem>>, vector<256x256xf32>
    %c0_8 = arith.constant 0 : index
    %c0_9 = arith.constant 0 : index
    %9 = vector.load %arg5[%c0_8, %c0_9] : memref<1x256xf32, #tpu.memory_space<vmem>>, vector<1x256xf32>
    %cst_10 = arith.constant dense<0.000000e+00> : vector<8x256xf32>
    %10 = tpu.matmul %7, %8, %cst_10 {dimension_numbers = #tpu.dot_dimension_numbers<[1], [0], [0], [1], [0, 0, 1, 1], [], []>} : vector<8x256xf32>, vector<256x256xf32>, vector<8x256xf32> -> vector<8x256xf32>
    %11 = vector.broadcast %9 : vector<1x256xf32> to vector<8x256xf32>
    %12 = arith.addf %10, %11 : vector<8x256xf32>
    %cst_11 = arith.constant 0.000000e+00 : f32
    %13 = vector.broadcast %cst_11 : f32 to vector<8x256xf32>
    %14 = arith.maximumf %12, %13 : vector<8x256xf32>
    %c0_12 = arith.constant 0 : index
    %c0_13 = arith.constant 0 : index
    %15 = vector.load %arg6[%c0_12, %c0_13] : memref<256x256xf32, #tpu.memory_space<vmem>>, vector<256x256xf32>
    %c0_14 = arith.constant 0 : index
    %c0_15 = arith.constant 0 : index
    %16 = vector.load %arg7[%c0_14, %c0_15] : memref<1x256xf32, #tpu.memory_space<vmem>>, vector<1x256xf32>
    %cst_16 = arith.constant dense<0.000000e+00> : vector<8x256xf32>
    %17 = tpu.matmul %14, %15, %cst_16 {dimension_numbers = #tpu.dot_dimension_numbers<[1], [0], [0], [1], [0, 0, 1, 1], [], []>} : vector<8x256xf32>, vector<256x256xf32>, vector<8x256xf32> -> vector<8x256xf32>
    %18 = vector.broadcast %16 : vector<1x256xf32> to vector<8x256xf32>
    %19 = arith.addf %17, %18 : vector<8x256xf32>
    %cst_17 = arith.constant 0.000000e+00 : f32
    %20 = vector.broadcast %cst_17 : f32 to vector<8x256xf32>
    %21 = arith.maximumf %19, %20 : vector<8x256xf32>
    %c0_18 = arith.constant 0 : index
    %c0_19 = arith.constant 0 : index
    %22 = vector.load %arg8[%c0_18, %c0_19] : memref<8x256xf32, #tpu.memory_space<vmem>>, vector<8x256xf32>
    tpu.vector_store %arg8[%c0_18, %c0_19], %21 {strides = array<i32>} : memref<8x256xf32, #tpu.memory_space<vmem>>, vector<8x256xf32>,
    return
  }
  func.func @transform_0(%arg0: i32) -> (i32, i32) {
    %c0_i32 = arith.constant 0 : i32
    %c0_i32_0 = arith.constant 0 : i32
    return %arg0, %c0_i32 : i32, i32
  }
  func.func @transform_1(%arg0: i32) -> (i32, i32) {
    %c0_i32 = arith.constant 0 : i32
    %c0_i32_0 = arith.constant 0 : i32
    %c0_i32_1 = arith.constant 0 : i32
    return %c0_i32, %c0_i32_0 : i32, i32
  }
  func.func @transform_2(%arg0: i32) -> (i32, i32) {
    %c0_i32 = arith.constant 0 : i32
    %c0_i32_0 = arith.constant 0 : i32
    %c0_i32_1 = arith.constant 0 : i32
    return %c0_i32, %c0_i32_0 : i32, i32
  }
  func.func @transform_3(%arg0: i32) -> (i32, i32) {
    %c0_i32 = arith.constant 0 : i32
    %c0_i32_0 = arith.constant 0 : i32
    %c0_i32_1 = arith.constant 0 : i32
    return %c0_i32, %c0_i32_0 : i32, i32
  }
  func.func @transform_4(%arg0: i32) -> (i32, i32) {
    %c0_i32 = arith.constant 0 : i32
    %c0_i32_0 = arith.constant 0 : i32
    %c0_i32_1 = arith.constant 0 : i32
    return %c0_i32, %c0_i32_0 : i32, i32
  }
  func.func @transform_5(%arg0: i32) -> (i32, i32) {
    %c0_i32 = arith.constant 0 : i32
    %c0_i32_0 = arith.constant 0 : i32
    %c0_i32_1 = arith.constant 0 : i32
    return %c0_i32, %c0_i32_0 : i32, i32
  }
  func.func @transform_6(%arg0: i32) -> (i32, i32) {
    %c0_i32 = arith.constant 0 : i32
    %c0_i32_0 = arith.constant 0 : i32
    %c0_i32_1 = arith.constant 0 : i32
    return %c0_i32, %c0_i32_0 : i32, i32
  }
  func.func @transform_7(%arg0: i32) -> (i32, i32) {
    %c0_i32 = arith.constant 0 : i32
    %c0_i32_0 = arith.constant 0 : i32
    return %arg0, %c0_i32 : i32, i32
  }
}

module attributes {stable_mosaic.version = 11 : i64} {
  func.func @_fused_mlp_kernel(%arg0: i32, %arg1: memref<8x256xf32, #tpu.memory_space<vmem>>, %arg2: memref<256x256xf32, #tpu.memory_space<vmem>>, %arg3: memref<1x256xf32, #tpu.memory_space<vmem>>, %arg4: memref<256x256xf32, #tpu.memory_space<vmem>>, %arg5: memref<1x256xf32, #tpu.memory_space<vmem>>, %arg6: memref<256x256xf32, #tpu.memory_space<vmem>>, %arg7: memref<1x256xf32, #tpu.memory_space<vmem>>, %arg8: memref<8x256xf32, #tpu.memory_space<vmem>>) attributes {dimension_semantics = [#tpu.dimension_semantics<parallel>], iteration_bounds = array<i64: 1>, scalar_prefetch = 0 : i64, scratch_operands = 0 : i64, tpu.core_type = #tpu.core_type<tc>, window_params = [{transform_indices = @transform_0, window_bounds = array<i64: 8, 256>}, {pipeline_mode = #tpu.pipeline_mode<synchronous>, transform_indices = @transform_1, window_bounds = array<i64: 256, 256>}, {pipeline_mode = #tpu.pipeline_mode<synchronous>, transform_indices = @transform_2, window_bounds = array<i64: 1, 256>}, {pipeline_mode = #tpu.pipeline_mode<synchronous>, transform_indices = @transform_3, window_bounds = array<i64: 256, 256>}, {pipeline_mode = #tpu.pipeline_mode<synchronous>, transform_indices = @transform_4, window_bounds = array<i64: 1, 256>}, {pipeline_mode = #tpu.pipeline_mode<synchronous>, transform_indices = @transform_5, window_bounds = array<i64: 256, 256>}, {pipeline_mode = #tpu.pipeline_mode<synchronous>, transform_indices = @transform_6, window_bounds = array<i64: 1, 256>}, {transform_indices = @transform_7, window_bounds = array<i64: 8, 256>}]} {
    %c0 = arith.constant 0 : index
    %c0_0 = arith.constant 0 : index
    %0 = vector.load %arg1[%c0, %c0_0] : memref<8x256xf32, #tpu.memory_space<vmem>>, vector<8x256xf32>
    %c0_1 = arith.constant 0 : index
    %c0_2 = arith.constant 0 : index
    %1 = vector.load %arg2[%c0_1, %c0_2] : memref<256x256xf32, #tpu.memory_space<vmem>>, vector<256x256xf32>
    %c0_3 = arith.constant 0 : index
    %c0_4 = arith.constant 0 : index
    %2 = vector.load %arg3[%c0_3, %c0_4] : memref<1x256xf32, #tpu.memory_space<vmem>>, vector<1x256xf32>
    %cst = arith.constant dense<0.000000e+00> : vector<8x256xf32>
    %3 = tpu.matmul %0, %1, %cst {dimension_numbers = #tpu.dot_dimension_numbers<[1], [0], [0], [1], [0, 0, 1, 1], [], []>} : vector<8x256xf32>, vector<256x256xf32>, vector<8x256xf32> -> vector<8x256xf32>
    %4 = vector.broadcast %2 : vector<1x256xf32> to vector<8x256xf32>
    %5 = arith.addf %3, %4 : vector<8x256xf32>
    %cst_5 = arith.constant 0.000000e+00 : f32
    %6 = vector.broadcast %cst_5 : f32 to vector<8x256xf32>
    %7 = arith.maximumf %5, %6 : vector<8x256xf32>
    %c0_6 = arith.constant 0 : index
    %c0_7 = arith.constant 0 : index
    %8 = vector.load %arg4[%c0_6, %c0_7] : memref<256x256xf32, #tpu.memory_space<vmem>>, vector<256x256xf32>
    %c0_8 = arith.constant 0 : index
    %c0_9 = arith.constant 0 : index
    %9 = vector.load %arg5[%c0_8, %c0_9] : memref<1x256xf32, #tpu.memory_space<vmem>>, vector<1x256xf32>
    %cst_10 = arith.constant dense<0.000000e+00> : vector<8x256xf32>
    %10 = tpu.matmul %7, %8, %cst_10 {dimension_numbers = #tpu.dot_dimension_numbers<[1], [0], [0], [1], [0, 0, 1, 1], [], []>} : vector<8x256xf32>, vector<256x256xf32>, vector<8x256xf32> -> vector<8x256xf32>
    %11 = vector.broadcast %9 : vector<1x256xf32> to vector<8x256xf32>
    %12 = arith.addf %10, %11 : vector<8x256xf32>
    %cst_11 = arith.constant 0.000000e+00 : f32
    %13 = vector.broadcast %cst_11 : f32 to vector<8x256xf32>
    %14 = arith.maximumf %12, %13 : vector<8x256xf32>
    %c0_12 = arith.constant 0 : index
    %c0_13 = arith.constant 0 : index
    %15 = vector.load %arg6[%c0_12, %c0_13] : memref<256x256xf32, #tpu.memory_space<vmem>>, vector<256x256xf32>
    %c0_14 = arith.constant 0 : index
    %c0_15 = arith.constant 0 : index
    %16 = vector.load %arg7[%c0_14, %c0_15] : memref<1x256xf32, #tpu.memory_space<vmem>>, vector<1x256xf32>
    %cst_16 = arith.constant dense<0.000000e+00> : vector<8x256xf32>
    %17 = tpu.matmul %14, %15, %cst_16 {dimension_numbers = #tpu.dot_dimension_numbers<[1], [0], [0], [1], [0, 0, 1, 1], [], []>} : vector<8x256xf32>, vector<256x256xf32>, vector<8x256xf32> -> vector<8x256xf32>
    %18 = vector.broadcast %16 : vector<1x256xf32> to vector<8x256xf32>
    %19 = arith.addf %17, %18 : vector<8x256xf32>
    %cst_17 = arith.constant 0.000000e+00 : f32
    %20 = vector.broadcast %cst_17 : f32 to vector<8x256xf32>
    %21 = arith.maximumf %19, %20 : vector<8x256xf32>
    %c0_18 = arith.constant 0 : index
    %c0_19 = arith.constant 0 : index
    %22 = vector.load %arg8[%c0_18, %c0_19] : memref<8x256xf32, #tpu.memory_space<vmem>>, vector<8x256xf32>
    tpu.vector_store %arg8[%c0_18, %c0_19], %21 {strides = array<i32>} : memref<8x256xf32, #tpu.memory_space<vmem>>, vector<8x256xf32>,
    return
  }
  func.func @transform_0(%arg0: i32) -> (i32, i32) {
    %c0_i32 = arith.constant 0 : i32
    %c0_i32_0 = arith.constant 0 : i32
    return %arg0, %c0_i32 : i32, i32
  }
  func.func @transform_1(%arg0: i32) -> (i32, i32) {
    %c0_i32 = arith.constant 0 : i32
    %c0_i32_0 = arith.constant 0 : i32
    %c0_i32_1 = arith.constant 0 : i32
    return %c0_i32, %c0_i32_0 : i32, i32
  }
  func.func @transform_2(%arg0: i32) -> (i32, i32) {
    %c0_i32 = arith.constant 0 : i32
    %c0_i32_0 = arith.constant 0 : i32
    %c0_i32_1 = arith.constant 0 : i32
    return %c0_i32, %c0_i32_0 : i32, i32
  }
  func.func @transform_3(%arg0: i32) -> (i32, i32) {
    %c0_i32 = arith.constant 0 : i32
    %c0_i32_0 = arith.constant 0 : i32
    %c0_i32_1 = arith.constant 0 : i32
    return %c0_i32, %c0_i32_0 : i32, i32
  }
  func.func @transform_4(%arg0: i32) -> (i32, i32) {
    %c0_i32 = arith.constant 0 : i32
    %c0_i32_0 = arith.constant 0 : i32
    %c0_i32_1 = arith.constant 0 : i32
    return %c0_i32, %c0_i32_0 : i32, i32
  }
  func.func @transform_5(%arg0: i32) -> (i32, i32) {
    %c0_i32 = arith.constant 0 : i32
    %c0_i32_0 = arith.constant 0 : i32
    %c0_i32_1 = arith.constant 0 : i32
    return %c0_i32, %c0_i32_0 : i32, i32
  }
  func.func @transform_6(%arg0: i32) -> (i32, i32) {
    %c0_i32 = arith.constant 0 : i32
    %c0_i32_0 = arith.constant 0 : i32
    %c0_i32_1 = arith.constant 0 : i32
    return %c0_i32, %c0_i32_0 : i32, i32
  }
  func.func @transform_7(%arg0: i32) -> (i32, i32) {
    %c0_i32 = arith.constant 0 : i32
    %c0_i32_0 = arith.constant 0 : i32
    return %arg0, %c0_i32 : i32, i32
  }
}

</mosaic_0001>

<bundles_post_ra>
// kernel: mlp_forward.1
= control target key start
LH: loop header
LB: loop body
LE: loop exit
PB: predicated region body
PF: predicated region fallthrough
CT: control target
= control target key end

     0   :  { %12 = vsyncpa [#allocation3], 0  ;;  %s695_s0 = inlined_call_operand.vmem [shape: f32[8,256], index: 0, kind: input, shape index: {}]   ;;  %s696_s1 = inlined_call_operand.hbm [shape: f32[256,256], index: 1, kind: input, shape index: {}]   ;;  %s697_s2 = inlined_call_operand.vmem [shape: f32[1,256], index: 2, kind: input, shape index: {}]   ;;  %s698_s3 = inlined_call_operand.hbm [shape: f32[256,256], index: 3, kind: input, shape index: {}]   ;;  %s699_s4 = inlined_call_operand.vmem [shape: f32[1,256], index: 4, kind: input, shape index: {}]   ;;  %s700_s5 = inlined_call_operand.hbm [shape: f32[256,256], index: 5, kind: input, shape index: {}]   ;;  %s701_s6 = inlined_call_operand.vmem [shape: f32[1,256], index: 6, kind: input, shape index: {}]   ;;  %s702_s7 = inlined_call_operand.vmem [shape: f32[8,256], index: 7, kind: output, shape index: {}]  }
   0x1   :  { %13 = vsyncpa [#allocation5], 0  ;;  %s35_s26 = sshll.u32 %s698_s3, 4  ;;  %s620_s27 = smov [#allocation4]   ;;  %s36_s26 = int_to_ptr.hbm [resolvable:$true] %s35_s26 }
   0x2   :  { %s37_s28 = sshll.u32 %s620_s27, 4  ;;  %s20_s8 = sshll.u32 %s696_s1, 4  ;;  %s38_s28 = int_to_ptr.vmem [resolvable:$true] %s37_s28  ;;  %s21_s8 = int_to_ptr.hbm [resolvable:$true] %s20_s8 }
   0x3   :  { %s621_s9 = smov 256   ;;  %s622_s10 = smov 16  }
   0x4   :  { %43 = dma.hbm_to_vmem [thread:$0]  %s36_s26, 8192, %s38_s28, [#allocation5], %s621_s9, %s621_s9, %s622_s10  }
   0x5   :  { %s623_s11 = smov [#allocation2]   ;;  %s50_s15 = sshll.u32 %s700_s5, 4  ;;  %s51_s15 = int_to_ptr.hbm [resolvable:$true] %s50_s15 }
   0x6   :  { %s22_s12 = sshll.u32 %s623_s11, 4  ;;  %s624_s3 = smov [#allocation6]   ;;  %s23_s12 = int_to_ptr.vmem [resolvable:$true] %s22_s12 }
   0x7   :  { %28 = dma.hbm_to_vmem [thread:$0]  %s21_s8, 8192, %s23_s12, [#allocation3], %s621_s9, %s621_s9, %s622_s10  }
   0x8   :  { %s52_s16 = sshll.u32 %s624_s3, 4  ;;  %s53_s16 = int_to_ptr.vmem [resolvable:$true] %s52_s16 }
   0x9   :  { %58 = dma.hbm_to_vmem [thread:$0]  %s51_s15, 8192, %s53_s16, [#allocation5], %s621_s9, %s621_s9, %s622_s10  }
   0xa   :  { %616 = dma.done.wait [#allocation3], 8192  }
   0xb   :  { %617 = vsyncadd [#allocation3], 4294959104 }
   0xc   :  { %618 = dma.done.wait [#allocation5], 16384  }
   0xd   :  { %619 = vsyncadd [#allocation5], 4294950912  ;;  %v106_v0 = vld [vmem:[#allocation2 + $0xf8] sm:$0xff]  ;;  %v104_v1 = vld [vmem:[#allocation2 + $0xe8] sm:$0xff] }
   0xe   :  { %v138_v2 = vld [vmem:[#allocation2 + $0x1f8] sm:$0xff]  ;;  %185 = vmatpush.msra.mxu2 %v106_v0  ;;  %v105_v3 = vld [vmem:[#allocation2 + $0xf0] sm:$0xff]  ;;  %v136_v4 = vld [vmem:[#allocation2 + $0x1e8] sm:$0xff] }
   0xf   :  { %205 = vmatpush.msra.mxu3 %v138_v2  ;;  %145 = vmatpush.msra.mxu0 %v105_v3  ;;  %v102_v5 = vld [vmem:[#allocation2 + $0xd8] sm:$0xff]  ;;  %v103_v6 = vld [vmem:[#allocation2 + $0xe0] sm:$0xff]  ;;  %v137_v7 = vld [vmem:[#allocation2 + $0x1f0] sm:$0xff] }
  0x10   :  { %186 = vmatpush.msra.mxu2 %v104_v1  ;;  %v134_v8 = vld [vmem:[#allocation2 + $0x1d8] sm:$0xff]  ;;  %v101_v9 = vld [vmem:[#allocation2 + $0xd0] sm:$0xff]  ;;  %v135_v10 = vld [vmem:[#allocation2 + $0x1e0] sm:$0xff]  ;;  %165 = vmatpush.msra.mxu1 %v137_v7 }
  0x11   :  { %206 = vmatpush.msra.mxu3 %v136_v4  ;;  %146 = vmatpush.msra.mxu0 %v103_v6  ;;  %v100_v11 = vld [vmem:[#allocation2 + $0xc8] sm:$0xff]  ;;  %v99_v13 = vld [vmem:[#allocation2 + $0xc0] sm:$0xff]  ;;  %v133_v14 = vld [vmem:[#allocation2 + $0x1d0] sm:$0xff] }
  0x12   :  { %v132_v12 = vld [vmem:[#allocation2 + $0x1c8] sm:$0xff]  ;;  %187 = vmatpush.msra.mxu2 %v102_v5  ;;  %166 = vmatpush.msra.mxu1 %v135_v10  ;;  %v98_v15 = vld [vmem:[#allocation2 + $0xb8] sm:$0xff]  ;;  %v97_v17 = vld [vmem:[#allocation2 + $0xb0] sm:$0xff] }
  0x13   :  { %207 = vmatpush.msra.mxu3 %v134_v8  ;;  %147 = vmatpush.msra.mxu0 %v101_v9  ;;  %v130_v16 = vld [vmem:[#allocation2 + $0x1b8] sm:$0xff]  ;;  %v131_v18 = vld [vmem:[#allocation2 + $0x1c0] sm:$0xff]  ;;  %v96_v19 = vld [vmem:[#allocation2 + $0xa8] sm:$0xff] }
  0x14   :  { %188 = vmatpush.msra.mxu2 %v100_v11  ;;  %167 = vmatpush.msra.mxu1 %v133_v14  ;;  %v128_v20 = vld [vmem:[#allocation2 + $0x1a8] sm:$0xff]  ;;  %v95_v21 = vld [vmem:[#allocation2 + $0xa0] sm:$0xff]  ;;  %v129_v22 = vld [vmem:[#allocation2 + $0x1b0] sm:$0xff] }
  0x15   :  { %208 = vmatpush.msra.mxu3 %v132_v12  ;;  %148 = vmatpush.msra.mxu0 %v99_v13  ;;  %v94_v23 = vld [vmem:[#allocation2 + $0x98] sm:$0xff]  ;;  %v93_v25 = vld [vmem:[#allocation2 + $0x90] sm:$0xff]  ;;  %v127_v26 = vld [vmem:[#allocation2 + $0x1a0] sm:$0xff] }
  0x16   :  { %189 = vmatpush.msra.mxu2 %v98_v15  ;;  %168 = vmatpush.msra.mxu1 %v131_v18  ;;  %v126_v24 = vld [vmem:[#allocation2 + $0x198] sm:$0xff]  ;;  %v92_v27 = vld [vmem:[#allocation2 + $0x88] sm:$0xff]  ;;  %v91_v29 = vld [vmem:[#allocation2 + $0x80] sm:$0xff] }
  0x17   :  { %209 = vmatpush.msra.mxu3 %v130_v16  ;;  %149 = vmatpush.msra.mxu0 %v97_v17  ;;  %v124_v28 = vld [vmem:[#allocation2 + $0x188] sm:$0xff]  ;;  %v125_v30 = vld [vmem:[#allocation2 + $0x190] sm:$0xff]  ;;  %v90_v31 = vld [vmem:[#allocation2 + $0x78] sm:$0xff] }
  0x18   :  { %190 = vmatpush.msra.mxu2 %v96_v19  ;;  %169 = vmatpush.msra.mxu1 %v129_v22  ;;  %v122_v32 = vld [vmem:[#allocation2 + $0x178] sm:$0xff]  ;;  %v89_v33 = vld [vmem:[#allocation2 + $0x70] sm:$0xff]  ;;  %v123_v34 = vld [vmem:[#allocation2 + $0x180] sm:$0xff] }
  0x19   :  { %210 = vmatpush.msra.mxu3 %v128_v20  ;;  %150 = vmatpush.msra.mxu0 %v95_v21  ;;  %v88_v35 = vld [vmem:[#allocation2 + $0x68] sm:$0xff]  ;;  %v87_v37 = vld [vmem:[#allocation2 + $0x60] sm:$0xff]  ;;  %v121_v38 = vld [vmem:[#allocation2 + $0x170] sm:$0xff] }
  0x1a   :  { %191 = vmatpush.msra.mxu2 %v94_v23  ;;  %170 = vmatpush.msra.mxu1 %v127_v26  ;;  %v120_v36 = vld [vmem:[#allocation2 + $0x168] sm:$0xff]  ;;  %v86_v39 = vld [vmem:[#allocation2 + $0x58] sm:$0xff]  ;;  %v85_v41 = vld [vmem:[#allocation2 + $0x50] sm:$0xff] }
  0x1b   :  { %211 = vmatpush.msra.mxu3 %v126_v24  ;;  %151 = vmatpush.msra.mxu0 %v93_v25  ;;  %v118_v40 = vld [vmem:[#allocation2 + $0x158] sm:$0xff]  ;;  %v119_v42 = vld [vmem:[#allocation2 + $0x160] sm:$0xff]  ;;  %v84_v43 = vld [vmem:[#allocation2 + $0x48] sm:$0xff] }
  0x1c   :  { %192 = vmatpush.msra.mxu2 %v92_v27  ;;  %171 = vmatpush.msra.mxu1 %v125_v30  ;;  %v116_v44 = vld [vmem:[#allocation2 + $0x148] sm:$0xff]  ;;  %v83_v45 = vld [vmem:[#allocation2 + $0x40] sm:$0xff]  ;;  %v117_v46 = vld [vmem:[#allocation2 + $0x150] sm:$0xff] }
  0x1d   :  { %212 = vmatpush.msra.mxu3 %v124_v28  ;;  %152 = vmatpush.msra.mxu0 %v91_v29  ;;  %v82_v47 = vld [vmem:[#allocation2 + $0x38] sm:$0xff]  ;;  %v81_v49 = vld [vmem:[#allocation2 + $0x30] sm:$0xff]  ;;  %v115_v50 = vld [vmem:[#allocation2 + $0x140] sm:$0xff] }
  0x1e   :  { %193 = vmatpush.msra.mxu2 %v90_v31  ;;  %172 = vmatpush.msra.mxu1 %v123_v34  ;;  %v114_v48 = vld [vmem:[#allocation2 + $0x138] sm:$0xff]  ;;  %v80_v51 = vld [vmem:[#allocation2 + $0x28] sm:$0xff]  ;;  %v79_v53 = vld [vmem:[#allocation2 + $0x20] sm:$0xff] }
  0x1f   :  { %213 = vmatpush.msra.mxu3 %v122_v32  ;;  %153 = vmatpush.msra.mxu0 %v89_v33  ;;  %v112_v52 = vld [vmem:[#allocation2 + $0x128] sm:$0xff]  ;;  %v113_v54 = vld [vmem:[#allocation2 + $0x130] sm:$0xff]  ;;  %v78_v55 = vld [vmem:[#allocation2 + $0x18] sm:$0xff] }
  0x20   :  { %194 = vmatpush.msra.mxu2 %v88_v35  ;;  %173 = vmatpush.msra.mxu1 %v121_v38  ;;  %v110_v56 = vld [vmem:[#allocation2 + $0x118] sm:$0xff]  ;;  %v77_v57 = vld [vmem:[#allocation2 + $0x10] sm:$0xff]  ;;  %v111_v58 = vld [vmem:[#allocation2 + $0x120] sm:$0xff] }
  0x21   :  { %214 = vmatpush.msra.mxu3 %v120_v36  ;;  %154 = vmatpush.msra.mxu0 %v87_v37  ;;  %v76_v59 = vld [vmem:[#allocation2 + $0x8] sm:$0xff]  ;;  %v73_v61 = vld [vmem:[%s695_s0] sm:$0xff]  ;;  %v109_v0 = vld [vmem:[#allocation2 + $0x110] sm:$0xff] }
  0x22   :  { %195 = vmatpush.msra.mxu2 %v86_v39  ;;  %174 = vmatpush.msra.mxu1 %v119_v42  ;;  %v108_v60 = vld [vmem:[#allocation2 + $0x108] sm:$0xff]  ;;  %v75_v63 = vld [vmem:[#allocation2] sm:$0xff]  ;;  %v258_v1 = vld [vmem:[#allocation4 + $0xf8] sm:$0xff] }
  0x23   :  { %215 = vmatpush.msra.mxu3 %v118_v40  ;;  %155 = vmatpush.msra.mxu0 %v85_v41  ;;  %v74_v62 = vld [vmem:[%s695_s0 + $0x8] sm:$0xff]  ;;  %v107_v2 = vld [vmem:[#allocation2 + $0x100] sm:$0xff]  ;;  %v257_v3 = vld [vmem:[#allocation4 + $0xf0] sm:$0xff] }
  0x24   :  { %196 = vmatpush.msra.mxu2 %v84_v43  ;;  %175 = vmatpush.msra.mxu1 %v117_v46  ;;  %v256_v4 = vld [vmem:[#allocation4 + $0xe8] sm:$0xff]  ;;  %v255_v5 = vld [vmem:[#allocation4 + $0xe0] sm:$0xff]  ;;  %v289_v6 = vld [vmem:[#allocation4 + $0x1f0] sm:$0xff] }
  0x25   :  { %216 = vmatpush.msra.mxu3 %v116_v44  ;;  %156 = vmatpush.msra.mxu0 %v83_v45  ;;  %v290_v7 = vld [vmem:[#allocation4 + $0x1f8] sm:$0xff]  ;;  %v253_v9 = vld [vmem:[#allocation4 + $0xd0] sm:$0xff]  ;;  %v287_v10 = vld [vmem:[#allocation4 + $0x1e0] sm:$0xff] }
  0x26   :  { %197 = vmatpush.msra.mxu2 %v82_v47  ;;  %176 = vmatpush.msra.mxu1 %v115_v50  ;;  %v254_v8 = vld [vmem:[#allocation4 + $0xd8] sm:$0xff]  ;;  %v288_v11 = vld [vmem:[#allocation4 + $0x1e8] sm:$0xff]  ;;  %v251_v13 = vld [vmem:[#allocation4 + $0xc0] sm:$0xff] }
  0x27   :  { %217 = vmatpush.msra.mxu3 %v114_v48  ;;  %157 = vmatpush.msra.mxu0 %v81_v49  ;;  %v252_v12 = vld [vmem:[#allocation4 + $0xc8] sm:$0xff]  ;;  %v285_v14 = vld [vmem:[#allocation4 + $0x1d0] sm:$0xff]  ;;  %v286_v15 = vld [vmem:[#allocation4 + $0x1d8] sm:$0xff] }
  0x28   :  { %198 = vmatpush.msra.mxu2 %v80_v51  ;;  %177 = vmatpush.msra.mxu1 %v113_v54  ;;  %v250_v16 = vld [vmem:[#allocation4 + $0xb8] sm:$0xff]  ;;  %v249_v17 = vld [vmem:[#allocation4 + $0xb0] sm:$0xff]  ;;  %v283_v18 = vld [vmem:[#allocation4 + $0x1c0] sm:$0xff] }
  0x29   :  { %218 = vmatpush.msra.mxu3 %v112_v52  ;;  %158 = vmatpush.msra.mxu0 %v79_v53  ;;  %v284_v19 = vld [vmem:[#allocation4 + $0x1c8] sm:$0xff]  ;;  %v247_v21 = vld [vmem:[#allocation4 + $0xa0] sm:$0xff]  ;;  %v281_v22 = vld [vmem:[#allocation4 + $0x1b0] sm:$0xff] }
  0x2a   :  { %199 = vmatpush.msra.mxu2 %v78_v55  ;;  %178 = vmatpush.msra.mxu1 %v111_v58  ;;  %v248_v20 = vld [vmem:[#allocation4 + $0xa8] sm:$0xff]  ;;  %v282_v23 = vld [vmem:[#allocation4 + $0x1b8] sm:$0xff]  ;;  %v245_v25 = vld [vmem:[#allocation4 + $0x90] sm:$0xff] }
  0x2b   :  { %219 = vmatpush.msra.mxu3 %v110_v56  ;;  %159 = vmatpush.msra.mxu0 %v77_v57  ;;  %v246_v24 = vld [vmem:[#allocation4 + $0x98] sm:$0xff]  ;;  %v279_v26 = vld [vmem:[#allocation4 + $0x1a0] sm:$0xff]  ;;  %v280_v27 = vld [vmem:[#allocation4 + $0x1a8] sm:$0xff] }
  0x2c   :  { %200 = vmatpush.msra.mxu2 %v76_v59  ;;  %179 = vmatpush.msra.mxu1 %v109_v0  ;;  %v244_v28 = vld [vmem:[#allocation4 + $0x88] sm:$0xff]  ;;  %v243_v29 = vld [vmem:[#allocation4 + $0x80] sm:$0xff]  ;;  %v277_v30 = vld [vmem:[#allocation4 + $0x190] sm:$0xff] }
  0x2d   :  { %220 = vmatpush.msra.mxu3 %v108_v60  ;;  %201 = vmatmul.f32.vlgmr.msra.gmra.mxu2 %v73_v61  ;;  %v278_v31 = vld [vmem:[#allocation4 + $0x198] sm:$0xff]  ;;  %v241_v33 = vld [vmem:[#allocation4 + $0x70] sm:$0xff]  ;;  %v275_v34 = vld [vmem:[#allocation4 + $0x180] sm:$0xff] }
  0x2e   :  { %221 = vmatmul.f32.vlgmr.msra.gmra.mxu3 %v74_v62  ;;  %160 = vmatpush.msra.mxu0 %v75_v63  ;;  %v242_v32 = vld [vmem:[#allocation4 + $0x78] sm:$0xff]  ;;  %v276_v35 = vld [vmem:[#allocation4 + $0x188] sm:$0xff]  ;;  %v239_v37 = vld [vmem:[#allocation4 + $0x60] sm:$0xff] }
  0x2f   :  { %161 = vmatmul.f32.vlgmr.msra.gmra.mxu0 %v73_v61  ;;  %337 = vmatpush.msrb.mxu2 %v258_v1  ;;  %v240_v36 = vld [vmem:[#allocation4 + $0x68] sm:$0xff]  ;;  %v273_v38 = vld [vmem:[#allocation4 + $0x170] sm:$0xff]  ;;  %v274_v39 = vld [vmem:[#allocation4 + $0x178] sm:$0xff] }
  0x30   :  { %180 = vmatpush.msra.mxu1 %v107_v2  ;;  %297 = vmatpush.msrb.mxu0 %v257_v3  ;;  %v238_v40 = vld [vmem:[#allocation4 + $0x58] sm:$0xff]  ;;  %v237_v41 = vld [vmem:[#allocation4 + $0x50] sm:$0xff]  ;;  %v271_v42 = vld [vmem:[#allocation4 + $0x160] sm:$0xff] }
  0x31   :  { %181 = vmatmul.f32.vlgmr.msra.gmra.mxu1 %v74_v62  ;;  %338 = vmatpush.msrb.mxu2 %v256_v4  ;;  %v272_v43 = vld [vmem:[#allocation4 + $0x168] sm:$0xff]  ;;  %v235_v45 = vld [vmem:[#allocation4 + $0x40] sm:$0xff]  ;;  %v269_v46 = vld [vmem:[#allocation4 + $0x150] sm:$0xff] }
  0x32   :  { %298 = vmatpush.msrb.mxu0 %v255_v5  ;;  %317 = vmatpush.msrb.mxu1 %v289_v6  ;;  %v236_v44 = vld [vmem:[#allocation4 + $0x48] sm:$0xff]  ;;  %v270_v47 = vld [vmem:[#allocation4 + $0x158] sm:$0xff]  ;;  %v233_v48 = vld [vmem:[#allocation4 + $0x30] sm:$0xff] }
  0x33   :  { %357 = vmatpush.msrb.mxu3 %v290_v7  ;;  %339 = vmatpush.msrb.mxu2 %v254_v8  ;;  %v267_v49 = vld [vmem:[#allocation4 + $0x140] sm:$0xff]  ;;  %v234_v50 = vld [vmem:[#allocation4 + $0x38] sm:$0xff]  ;;  %v268_v51 = vld [vmem:[#allocation4 + $0x148] sm:$0xff] }
  0x34   :  { %299 = vmatpush.msrb.mxu0 %v253_v9  ;;  %318 = vmatpush.msrb.mxu1 %v287_v10  ;;  %v231_v52 = vld [vmem:[#allocation4 + $0x20] sm:$0xff]  ;;  %v265_v53 = vld [vmem:[#allocation4 + $0x130] sm:$0xff]  ;;  %v232_v54 = vld [vmem:[#allocation4 + $0x28] sm:$0xff] }
  0x35   :  { %358 = vmatpush.msrb.mxu3 %v288_v11  ;;  %340 = vmatpush.msrb.mxu2 %v252_v12  ;;  %v266_v55 = vld [vmem:[#allocation4 + $0x138] sm:$0xff]  ;;  %v229_v56 = vld [vmem:[#allocation4 + $0x10] sm:$0xff]  ;;  %v263_v57 = vld [vmem:[#allocation4 + $0x120] sm:$0xff] }
  0x36   :  { %300 = vmatpush.msrb.mxu0 %v251_v13  ;;  %319 = vmatpush.msrb.mxu1 %v285_v14  ;;  %v230_v58 = vld [vmem:[#allocation4 + $0x18] sm:$0xff]  ;;  %v264_v59 = vld [vmem:[#allocation4 + $0x128] sm:$0xff]  ;;  %v227_v60 = vld [vmem:[#allocation4] sm:$0xff] }
  0x37   :  { %359 = vmatpush.msrb.mxu3 %v286_v15  ;;  %341 = vmatpush.msrb.mxu2 %v250_v16  ;;  %v261_v61 = vld [vmem:[#allocation4 + $0x110] sm:$0xff]  ;;  %v228_v62 = vld [vmem:[#allocation4 + $0x8] sm:$0xff]  ;;  %v262_v63 = vld [vmem:[#allocation4 + $0x118] sm:$0xff] }
  0x38   :  { %301 = vmatpush.msrb.mxu0 %v249_v17  ;;  %320 = vmatpush.msrb.mxu1 %v283_v18  ;;  %v259_v0 = vld [vmem:[#allocation4 + $0x100] sm:$0xff]  ;;  %v260_v1 = vld [vmem:[#allocation4 + $0x108] sm:$0xff]  ;;  %v409_v2 = vld [vmem:[#allocation6 + $0xf0] sm:$0xff] }
  0x39   :  { %360 = vmatpush.msrb.mxu3 %v284_v19  ;;  %342 = vmatpush.msrb.mxu2 %v248_v20  ;;  %v410_v3 = vld [vmem:[#allocation6 + $0xf8] sm:$0xff]  ;;  %v407_v4 = vld [vmem:[#allocation6 + $0xe0] sm:$0xff]  ;;  %v408_v5 = vld [vmem:[#allocation6 + $0xe8] sm:$0xff] }
  0x3a   :  { %302 = vmatpush.msrb.mxu0 %v247_v21  ;;  %321 = vmatpush.msrb.mxu1 %v281_v22  ;;  %v405_v6 = vld [vmem:[#allocation6 + $0xd0] sm:$0xff]  ;;  %v406_v7 = vld [vmem:[#allocation6 + $0xd8] sm:$0xff]  ;;  %v439_v10 = vld [vmem:[#allocation6 + $0x1e0] sm:$0xff] }
  0x3b   :  { %361 = vmatpush.msrb.mxu3 %v282_v23  ;;  %343 = vmatpush.msrb.mxu2 %v246_v24  ;;  %v441_v8 = vld [vmem:[#allocation6 + $0x1f0] sm:$0xff]  ;;  %v442_v9 = vld [vmem:[#allocation6 + $0x1f8] sm:$0xff]  ;;  %v403_v11 = vld [vmem:[#allocation6 + $0xc0] sm:$0xff] }
  0x3c   :  { %303 = vmatpush.msrb.mxu0 %v245_v25  ;;  %322 = vmatpush.msrb.mxu1 %v279_v26  ;;  %v404_v12 = vld [vmem:[#allocation6 + $0xc8] sm:$0xff]  ;;  %v437_v14 = vld [vmem:[#allocation6 + $0x1d0] sm:$0xff]  ;;  %v438_v15 = vld [vmem:[#allocation6 + $0x1d8] sm:$0xff] }
  0x3d   :  { %362 = vmatpush.msrb.mxu3 %v280_v27  ;;  %344 = vmatpush.msrb.mxu2 %v244_v28  ;;  %v440_v13 = vld [vmem:[#allocation6 + $0x1e8] sm:$0xff]  ;;  %v401_v16 = vld [vmem:[#allocation6 + $0xb0] sm:$0xff]  ;;  %v402_v17 = vld [vmem:[#allocation6 + $0xb8] sm:$0xff] }
  0x3e   :  { %304 = vmatpush.msrb.mxu0 %v243_v29  ;;  %323 = vmatpush.msrb.mxu1 %v277_v30  ;;  %v435_v18 = vld [vmem:[#allocation6 + $0x1c0] sm:$0xff]  ;;  %v436_v19 = vld [vmem:[#allocation6 + $0x1c8] sm:$0xff]  ;;  %v433_v22 = vld [vmem:[#allocation6 + $0x1b0] sm:$0xff] }
  0x3f   :  { %363 = vmatpush.msrb.mxu3 %v278_v31  ;;  %345 = vmatpush.msrb.mxu2 %v242_v32  ;;  %v399_v20 = vld [vmem:[#allocation6 + $0xa0] sm:$0xff]  ;;  %v400_v21 = vld [vmem:[#allocation6 + $0xa8] sm:$0xff]  ;;  %v434_v23 = vld [vmem:[#allocation6 + $0x1b8] sm:$0xff] }
  0x40   :  { %305 = vmatpush.msrb.mxu0 %v241_v33  ;;  %324 = vmatpush.msrb.mxu1 %v275_v34  ;;  %v397_v24 = vld [vmem:[#allocation6 + $0x90] sm:$0xff]  ;;  %v398_v25 = vld [vmem:[#allocation6 + $0x98] sm:$0xff]  ;;  %v431_v26 = vld [vmem:[#allocation6 + $0x1a0] sm:$0xff] }
  0x41   :  { %364 = vmatpush.msrb.mxu3 %v276_v35  ;;  %346 = vmatpush.msrb.mxu2 %v240_v36  ;;  %v432_v27 = vld [vmem:[#allocation6 + $0x1a8] sm:$0xff]  ;;  %v395_v28 = vld [vmem:[#allocation6 + $0x80] sm:$0xff]  ;;  %v429_v30 = vld [vmem:[#allocation6 + $0x190] sm:$0xff] }
  0x42   :  { %306 = vmatpush.msrb.mxu0 %v239_v37  ;;  %325 = vmatpush.msrb.mxu1 %v273_v38  ;;  %v396_v29 = vld [vmem:[#allocation6 + $0x88] sm:$0xff]  ;;  %v430_v31 = vld [vmem:[#allocation6 + $0x198] sm:$0xff]  ;;  %v393_v32 = vld [vmem:[#allocation6 + $0x70] sm:$0xff] }
  0x43   :  { %365 = vmatpush.msrb.mxu3 %v274_v39  ;;  %347 = vmatpush.msrb.mxu2 %v238_v40  ;;  %v394_v33 = vld [vmem:[#allocation6 + $0x78] sm:$0xff]  ;;  %v139_v34 = vld [vmem:[%s697_s2] sm:$0x3]  ;;  %v428_v36 = vld [vmem:[#allocation6 + $0x188] sm:$0xff] }
  0x44   :  { %307 = vmatpush.msrb.mxu0 %v237_v41  ;;  %326 = vmatpush.msrb.mxu1 %v271_v42  ;;  %v427_v35 = vld [vmem:[#allocation6 + $0x180] sm:$0xff]  ;;  %v392_v38 = vld [vmem:[#allocation6 + $0x68] sm:$0xff]  ;;  %v425_v39 = vld [vmem:[#allocation6 + $0x170] sm:$0xff]  ;;  %v141_v41 = vperm.slane %v139_v34, 0 }
  0x45   :  { %366 = vmatpush.msrb.mxu3 %v272_v43  ;;  %348 = vmatpush.msrb.mxu2 %v236_v44  ;;  %v391_v37 = vld [vmem:[#allocation6 + $0x60] sm:$0xff]  ;;  %v426_v40 = vld [vmem:[#allocation6 + $0x178] sm:$0xff]  ;;  %v389_v42 = vld [vmem:[#allocation6 + $0x50] sm:$0xff] }
  0x46   :  { %308 = vmatpush.msrb.mxu0 %v235_v45  ;;  %327 = vmatpush.msrb.mxu1 %v269_v46  ;;  %v390_v43 = vld [vmem:[#allocation6 + $0x58] sm:$0xff]  ;;  %v387_v44 = vld [vmem:[#allocation6 + $0x40] sm:$0xff]  ;;  %v388_v45 = vld [vmem:[#allocation6 + $0x48] sm:$0xff] }
  0x47   :  { %367 = vmatpush.msrb.mxu3 %v270_v47  ;;  %349 = vmatpush.msrb.mxu2 %v234_v50 }
  0x48   :  { %309 = vmatpush.msrb.mxu0 %v233_v48  ;;  %328 = vmatpush.msrb.mxu1 %v267_v49  ;;  %v142_v48 = vperm.slane %v139_v34, 1 }
  0x49   :  { %368 = vmatpush.msrb.mxu3 %v268_v51  ;;  %350 = vmatpush.msrb.mxu2 %v232_v54 }
  0x4a   :  { %310 = vmatpush.msrb.mxu0 %v231_v52  ;;  %329 = vmatpush.msrb.mxu1 %v265_v53 }
  0x4b   :  { %369 = vmatpush.msrb.mxu3 %v266_v55  ;;  %351 = vmatpush.msrb.mxu2 %v230_v58  ;;  %v423_v58 = vld [vmem:[#allocation6 + $0x160] sm:$0xff] }
  0x4c   :  { %311 = vmatpush.msrb.mxu0 %v229_v56  ;;  %330 = vmatpush.msrb.mxu1 %v263_v57  ;;  %v385_v57 = vld [vmem:[#allocation6 + $0x30] sm:$0xff] }
  0x4d   :  { %370 = vmatpush.msrb.mxu3 %v264_v59  ;;  %352 = vmatpush.msrb.mxu2 %v228_v62  ;;  %v386_v59 = vld [vmem:[#allocation6 + $0x38] sm:$0xff]  ;;  %v421_v62 = vld [vmem:[#allocation6 + $0x150] sm:$0xff] }
  0x4e   :  { %312 = vmatpush.msrb.mxu0 %v227_v60  ;;  %331 = vmatpush.msrb.mxu1 %v261_v61  ;;  %v424_v60 = vld [vmem:[#allocation6 + $0x168] sm:$0xff]  ;;  %v383_v61 = vld [vmem:[#allocation6 + $0x20] sm:$0xff] }
  0x4f   :  { %371 = vmatpush.msrb.mxu3 %v262_v63  ;;  %489 = vmatpush.msra.mxu2 %v410_v3  ;;  %v384_v63 = vld [vmem:[#allocation6 + $0x28] sm:$0xff]  ;;  %v382_v3 = vld [vmem:[#allocation6 + $0x18] sm:$0xff] }
  0x50   :  { %332 = vmatpush.msrb.mxu1 %v259_v0  ;;  %449 = vmatpush.msra.mxu0 %v409_v2  ;;  %v422_v0 = vld [vmem:[#allocation6 + $0x158] sm:$0xff]  ;;  %v419_v2 = vld [vmem:[#allocation6 + $0x140] sm:$0xff] }
  0x51   :  { %372 = vmatpush.msrb.mxu3 %v260_v1  ;;  %490 = vmatpush.msra.mxu2 %v408_v5  ;;  %v381_v1 = vld [vmem:[#allocation6 + $0x10] sm:$0xff]  ;;  %v379_v5 = vld [vmem:[#allocation6] sm:$0xff] }
  0x52   :  { %450 = vmatpush.msra.mxu0 %v407_v4  ;;  %469 = vmatpush.msra.mxu1 %v441_v8  ;;  %v420_v4 = vld [vmem:[#allocation6 + $0x148] sm:$0xff]  ;;  %v418_v8 = vld [vmem:[#allocation6 + $0x138] sm:$0xff] }
  0x53   :  { %509 = vmatpush.msra.mxu3 %v442_v9  ;;  %491 = vmatpush.msra.mxu2 %v406_v7  ;;  %v380_v7 = vld [vmem:[#allocation6 + $0x8] sm:$0xff]  ;;  %v415_v9 = vld [vmem:[#allocation6 + $0x120] sm:$0xff] }
  0x54   :  { %451 = vmatpush.msra.mxu0 %v405_v6  ;;  %470 = vmatpush.msra.mxu1 %v439_v10  ;;  %v417_v6 = vld [vmem:[#allocation6 + $0x130] sm:$0xff]  ;;  %v416_v10 = vld [vmem:[#allocation6 + $0x128] sm:$0xff] }
  0x55   :  { %510 = vmatpush.msra.mxu3 %v440_v13  ;;  %492 = vmatpush.msra.mxu2 %v404_v12  ;;  %v414_v12 = vld [vmem:[#allocation6 + $0x118] sm:$0xff]  ;;  %v411_v13 = vld [vmem:[#allocation6 + $0x100] sm:$0xff] }
  0x56   :  { %452 = vmatpush.msra.mxu0 %v403_v11  ;;  %471 = vmatpush.msra.mxu1 %v437_v14  ;;  %v413_v11 = vld [vmem:[#allocation6 + $0x110] sm:$0xff]  ;;  %v412_v14 = vld [vmem:[#allocation6 + $0x108] sm:$0xff] }
  0x57   :  { %511 = vmatpush.msra.mxu3 %v438_v15  ;;  %493 = vmatpush.msra.mxu2 %v402_v17  ;;  %v291_v15 = vld [vmem:[%s699_s4] sm:$0x3] }
  0x58   :  { %453 = vmatpush.msra.mxu0 %v401_v16  ;;  %472 = vmatpush.msra.mxu1 %v435_v18  ;;  %v293_v16 = vperm.slane %v291_v15, 0 }
  0x59   :  { %512 = vmatpush.msra.mxu3 %v436_v19  ;;  %494 = vmatpush.msra.mxu2 %v400_v21  ;;  %v294_v19 = vperm.slane %v291_v15, 1 }
  0x5a   :  { %454 = vmatpush.msra.mxu0 %v399_v20  ;;  %473 = vmatpush.msra.mxu1 %v433_v22 }
  0x5b   :  { %513 = vmatpush.msra.mxu3 %v434_v23  ;;  %495 = vmatpush.msra.mxu2 %v398_v25 }
  0x5c   :  { %455 = vmatpush.msra.mxu0 %v397_v24  ;;  %474 = vmatpush.msra.mxu1 %v431_v26 }
  0x5d   :  { %514 = vmatpush.msra.mxu3 %v432_v27  ;;  %496 = vmatpush.msra.mxu2 %v396_v29 }
  0x5e   :  { %456 = vmatpush.msra.mxu0 %v395_v28  ;;  %475 = vmatpush.msra.mxu1 %v429_v30  ;;  %v443_v28 = vld [vmem:[%s701_s6] sm:$0x3] }
  0x5f   :  { %515 = vmatpush.msra.mxu3 %v430_v31  ;;  %497 = vmatpush.msra.mxu2 %v394_v33  ;;  %v445_v29 = vperm.slane %v443_v28, 0  ;;  %v446_v34 = vperm.slane %v443_v28, 1 }
  0x60   :  { %457 = vmatpush.msra.mxu0 %v393_v32  ;;  %476 = vmatpush.msra.mxu1 %v427_v35 }
  0x61   :  { %516 = vmatpush.msra.mxu3 %v428_v36  ;;  %498 = vmatpush.msra.mxu2 %v392_v38 }
  0x62   :  { %458 = vmatpush.msra.mxu0 %v391_v37  ;;  %477 = vmatpush.msra.mxu1 %v425_v39 }
  0x63   :  { %517 = vmatpush.msra.mxu3 %v426_v40  ;;  %499 = vmatpush.msra.mxu2 %v390_v43 }
  0x64   :  { %459 = vmatpush.msra.mxu0 %v389_v42  ;;  %478 = vmatpush.msra.mxu1 %v423_v58 }
  0x65   :  { %500 = vmatpush.msra.mxu2 %v388_v45  ;;  %518 = vmatpush.msra.mxu3 %v424_v60 }
  0x66   :  { %460 = vmatpush.msra.mxu0 %v387_v44  ;;  %479 = vmatpush.msra.mxu1 %v421_v62 }
  0x67   :  { %501 = vmatpush.msra.mxu2 %v386_v59  ;;  %519 = vmatpush.msra.mxu3 %v422_v0 }
  0x68   :  { %461 = vmatpush.msra.mxu0 %v385_v57  ;;  %480 = vmatpush.msra.mxu1 %v419_v2 }
  0x69   :  { %502 = vmatpush.msra.mxu2 %v384_v63  ;;  %520 = vmatpush.msra.mxu3 %v420_v4 }
  0x6a   :  { %462 = vmatpush.msra.mxu0 %v383_v61  ;;  %481 = vmatpush.msra.mxu1 %v417_v6 }
  0x6b   :  { %503 = vmatpush.msra.mxu2 %v382_v3  ;;  %521 = vmatpush.msra.mxu3 %v418_v8 }
  0x6c   :  { %463 = vmatpush.msra.mxu0 %v381_v1  ;;  %482 = vmatpush.msra.mxu1 %v415_v9 }
  0x6d   :  { %504 = vmatpush.msra.mxu2 %v380_v7  ;;  %522 = vmatpush.msra.mxu3 %v416_v10 }
  0x6e   :  { %464 = vmatpush.msra.mxu0 %v379_v5  ;;  %483 = vmatpush.msra.mxu1 %v413_v11 }
  0x6f   :  { %523 = vmatpush.msra.mxu3 %v414_v12 }
  0x70   :  { %484 = vmatpush.msra.mxu1 %v411_v13 }
  0x71   :  { %524 = vmatpush.msra.mxu3 %v412_v14 }
  0xac   :  { %v162_v46 = vpop.f32.mrf.mxu0 }
  0xad   :  { %v163_v47 = vadd.f32 %v162_v46, %v141_v41 }
  0xae   :  { %v182_v49 = vpop.f32.mrf.mxu1 }
  0xaf   :  { %v183_v50 = vadd.f32 %v182_v49, %v163_v47 }
  0xb0   :  { %v202_v51 = vpop.f32.mrf.mxu2 }
  0xb1   :  { %v222_v52 = vpop.f32.mrf.mxu3  ;;  %v225_v53 = vmax.f32 %v183_v50, 0.0  ;;  %v203_v54 = vadd.f32 %v202_v51, %v142_v48 }
  0xb3   :  { %v223_v55 = vadd.f32 %v222_v52, %v203_v54  ;;  %313 = vmatmul.f32.vlgmr.msrb.gmra.mxu0 %v225_v53  ;;  %353 = vmatmul.f32.vlgmr.msrb.gmra.mxu2 %v225_v53 }
  0xb5   :  { %v226_v56 = vmax.f32 %v223_v55, 0.0 }
  0xb7   :  { %333 = vmatmul.f32.vlgmr.msrb.gmra.mxu1 %v226_v56  ;;  %373 = vmatmul.f32.vlgmr.msrb.gmra.mxu3 %v226_v56 }
 0x130   :  { %v314_v17 = vpop.f32.mrf.mxu0 }
 0x131   :  { %v315_v18 = vadd.f32 %v314_v17, %v293_v16 }
 0x134   :  { %v334_v20 = vpop.f32.mrf.mxu1 }
 0x135   :  { %v335_v21 = vadd.f32 %v334_v20, %v315_v18 }
 0x136   :  { %v354_v22 = vpop.f32.mrf.mxu2 }
 0x137   :  { %v377_v23 = vmax.f32 %v335_v21, 0.0  ;;  %v355_v24 = vadd.f32 %v354_v22, %v294_v19 }
 0x139   :  { %465 = vmatmul.f32.vlgmr.msra.gmra.mxu0 %v377_v23  ;;  %505 = vmatmul.f32.vlgmr.msra.gmra.mxu2 %v377_v23 }
 0x13a   :  { %v374_v25 = vpop.f32.mrf.mxu3 }
 0x13b   :  { %v375_v26 = vadd.f32 %v374_v25, %v355_v24 }
 0x13d   :  { %v378_v27 = vmax.f32 %v375_v26, 0.0 }
 0x13f   :  { %485 = vmatmul.f32.vlgmr.msra.gmra.mxu1 %v378_v27  ;;  %525 = vmatmul.f32.vlgmr.msra.gmra.mxu3 %v378_v27 }
 0x1b6   :  { %v466_v30 = vpop.f32.mrf.mxu0 }
 0x1b7   :  { %v467_v31 = vadd.f32 %v466_v30, %v445_v29 }
 0x1bc   :  { %v486_v32 = vpop.f32.mrf.mxu1  ;;  %v506_v35 = vpop.f32.mrf.mxu2 }
 0x1bd   :  { %v487_v33 = vadd.f32 %v486_v32, %v467_v31  ;;  %v507_v37 = vadd.f32 %v506_v35, %v446_v34 }
 0x1bf   :  { %v529_v36 = vmax.f32 %v487_v33, 0.0 }
 0x1c1   :  { %531 = vst [vmem:[%s702_s7] sm:$0xff] %v529_v36 }
 0x1c2   :  { %v526_v38 = vpop.f32.mrf.mxu3 }
 0x1c3   :  { %v527_v39 = vadd.f32 %v526_v38, %v507_v37 }
 0x1c5   :  { %v530_v40 = vmax.f32 %v527_v39, 0.0 }
 0x1c7   :  { %532 = vst [vmem:[%s702_s7 + $0x8] sm:$0xff] %v530_v40 }
 0x1c8   :  { %537 = vsyncpa [#allocation3], 1 }
 0x1c9   :  { %538 = vsyncpa [#allocation5], 1 }

// kernel: mlp_forward.1
= control target key start
LH: loop header
LB: loop body
LE: loop exit
PB: predicated region body
PF: predicated region fallthrough
CT: control target
= control target key end

     0   :  { %12 = vsyncpa [#allocation3], 0  ;;  %s695_s0 = inlined_call_operand.vmem [shape: f32[8,256], index: 0, kind: input, shape index: {}]   ;;  %s696_s1 = inlined_call_operand.hbm [shape: f32[256,256], index: 1, kind: input, shape index: {}]   ;;  %s697_s2 = inlined_call_operand.vmem [shape: f32[1,256], index: 2, kind: input, shape index: {}]   ;;  %s698_s3 = inlined_call_operand.hbm [shape: f32[256,256], index: 3, kind: input, shape index: {}]   ;;  %s699_s4 = inlined_call_operand.vmem [shape: f32[1,256], index: 4, kind: input, shape index: {}]   ;;  %s700_s5 = inlined_call_operand.hbm [shape: f32[256,256], index: 5, kind: input, shape index: {}]   ;;  %s701_s6 = inlined_call_operand.vmem [shape: f32[1,256], index: 6, kind: input, shape index: {}]   ;;  %s702_s7 = inlined_call_operand.vmem [shape: f32[8,256], index: 7, kind: output, shape index: {}]  }
   0x1   :  { %13 = vsyncpa [#allocation5], 0  ;;  %s35_s26 = sshll.u32 %s698_s3, 4  ;;  %s620_s27 = smov [#allocation4]   ;;  %s36_s26 = int_to_ptr.hbm [resolvable:$true] %s35_s26 }
   0x2   :  { %s37_s28 = sshll.u32 %s620_s27, 4  ;;  %s20_s8 = sshll.u32 %s696_s1, 4  ;;  %s38_s28 = int_to_ptr.vmem [resolvable:$true] %s37_s28  ;;  %s21_s8 = int_to_ptr.hbm [resolvable:$true] %s20_s8 }
   0x3   :  { %s621_s9 = smov 256   ;;  %s622_s10 = smov 16  }
   0x4   :  { %43 = dma.hbm_to_vmem [thread:$0]  %s36_s26, 8192, %s38_s28, [#allocation5], %s621_s9, %s621_s9, %s622_s10  }
   0x5   :  { %s623_s11 = smov [#allocation2]   ;;  %s50_s15 = sshll.u32 %s700_s5, 4  ;;  %s51_s15 = int_to_ptr.hbm [resolvable:$true] %s50_s15 }
   0x6   :  { %s22_s12 = sshll.u32 %s623_s11, 4  ;;  %s624_s3 = smov [#allocation6]   ;;  %s23_s12 = int_to_ptr.vmem [resolvable:$true] %s22_s12 }
   0x7   :  { %28 = dma.hbm_to_vmem [thread:$0]  %s21_s8, 8192, %s23_s12, [#allocation3], %s621_s9, %s621_s9, %s622_s10  }
   0x8   :  { %s52_s16 = sshll.u32 %s624_s3, 4  ;;  %s53_s16 = int_to_ptr.vmem [resolvable:$true] %s52_s16 }
   0x9   :  { %58 = dma.hbm_to_vmem [thread:$0]  %s51_s15, 8192, %s53_s16, [#allocation5], %s621_s9, %s621_s9, %s622_s10  }
   0xa   :  { %616 = dma.done.wait [#allocation3], 8192  }
   0xb   :  { %617 = vsyncadd [#allocation3], 4294959104 }
   0xc   :  { %618 = dma.done.wait [#allocation5], 16384  }
   0xd   :  { %619 = vsyncadd [#allocation5], 4294950912  ;;  %v106_v0 = vld [vmem:[#allocation2 + $0xf8] sm:$0xff]  ;;  %v104_v1 = vld [vmem:[#allocation2 + $0xe8] sm:$0xff] }
   0xe   :  { %v138_v2 = vld [vmem:[#allocation2 + $0x1f8] sm:$0xff]  ;;  %185 = vmatpush.msra.mxu2 %v106_v0  ;;  %v105_v3 = vld [vmem:[#allocation2 + $0xf0] sm:$0xff]  ;;  %v136_v4 = vld [vmem:[#allocation2 + $0x1e8] sm:$0xff] }
   0xf   :  { %205 = vmatpush.msra.mxu3 %v138_v2  ;;  %145 = vmatpush.msra.mxu0 %v105_v3  ;;  %v102_v5 = vld [vmem:[#allocation2 + $0xd8] sm:$0xff]  ;;  %v103_v6 = vld [vmem:[#allocation2 + $0xe0] sm:$0xff]  ;;  %v137_v7 = vld [vmem:[#allocation2 + $0x1f0] sm:$0xff] }
  0x10   :  { %186 = vmatpush.msra.mxu2 %v104_v1  ;;  %v134_v8 = vld [vmem:[#allocation2 + $0x1d8] sm:$0xff]  ;;  %v101_v9 = vld [vmem:[#allocation2 + $0xd0] sm:$0xff]  ;;  %v135_v10 = vld [vmem:[#allocation2 + $0x1e0] sm:$0xff]  ;;  %165 = vmatpush.msra.mxu1 %v137_v7 }
  0x11   :  { %206 = vmatpush.msra.mxu3 %v136_v4  ;;  %146 = vmatpush.msra.mxu0 %v103_v6  ;;  %v100_v11 = vld [vmem:[#allocation2 + $0xc8] sm:$0xff]  ;;  %v99_v13 = vld [vmem:[#allocation2 + $0xc0] sm:$0xff]  ;;  %v133_v14 = vld [vmem:[#allocation2 + $0x1d0] sm:$0xff] }
  0x12   :  { %v132_v12 = vld [vmem:[#allocation2 + $0x1c8] sm:$0xff]  ;;  %187 = vmatpush.msra.mxu2 %v102_v5  ;;  %166 = vmatpush.msra.mxu1 %v135_v10  ;;  %v98_v15 = vld [vmem:[#allocation2 + $0xb8] sm:$0xff]  ;;  %v97_v17 = vld [vmem:[#allocation2 + $0xb0] sm:$0xff] }
  0x13   :  { %207 = vmatpush.msra.mxu3 %v134_v8  ;;  %147 = vmatpush.msra.mxu0 %v101_v9  ;;  %v130_v16 = vld [vmem:[#allocation2 + $0x1b8] sm:$0xff]  ;;  %v131_v18 = vld [vmem:[#allocation2 + $0x1c0] sm:$0xff]  ;;  %v96_v19 = vld [vmem:[#allocation2 + $0xa8] sm:$0xff] }
  0x14   :  { %188 = vmatpush.msra.mxu2 %v100_v11  ;;  %167 = vmatpush.msra.mxu1 %v133_v14  ;;  %v128_v20 = vld [vmem:[#allocation2 + $0x1a8] sm:$0xff]  ;;  %v95_v21 = vld [vmem:[#allocation2 + $0xa0] sm:$0xff]  ;;  %v129_v22 = vld [vmem:[#allocation2 + $0x1b0] sm:$0xff] }
  0x15   :  { %208 = vmatpush.msra.mxu3 %v132_v12  ;;  %148 = vmatpush.msra.mxu0 %v99_v13  ;;  %v94_v23 = vld [vmem:[#allocation2 + $0x98] sm:$0xff]  ;;  %v93_v25 = vld [vmem:[#allocation2 + $0x90] sm:$0xff]  ;;  %v127_v26 = vld [vmem:[#allocation2 + $0x1a0] sm:$0xff] }
  0x16   :  { %189 = vmatpush.msra.mxu2 %v98_v15  ;;  %168 = vmatpush.msra.mxu1 %v131_v18  ;;  %v126_v24 = vld [vmem:[#allocation2 + $0x198] sm:$0xff]  ;;  %v92_v27 = vld [vmem:[#allocation2 + $0x88] sm:$0xff]  ;;  %v91_v29 = vld [vmem:[#allocation2 + $0x80] sm:$0xff] }
  0x17   :  { %209 = vmatpush.msra.mxu3 %v130_v16  ;;  %149 = vmatpush.msra.mxu0 %v97_v17  ;;  %v124_v28 = vld [vmem:[#allocation2 + $0x188] sm:$0xff]  ;;  %v125_v30 = vld [vmem:[#allocation2 + $0x190] sm:$0xff]  ;;  %v90_v31 = vld [vmem:[#allocation2 + $0x78] sm:$0xff] }
  0x18   :  { %190 = vmatpush.msra.mxu2 %v96_v19  ;;  %169 = vmatpush.msra.mxu1 %v129_v22  ;;  %v122_v32 = vld [vmem:[#allocation2 + $0x178] sm:$0xff]  ;;  %v89_v33 = vld [vmem:[#allocation2 + $0x70] sm:$0xff]  ;;  %v123_v34 = vld [vmem:[#allocation2 + $0x180] sm:$0xff] }
  0x19   :  { %210 = vmatpush.msra.mxu3 %v128_v20  ;;  %150 = vmatpush.msra.mxu0 %v95_v21  ;;  %v88_v35 = vld [vmem:[#allocation2 + $0x68] sm:$0xff]  ;;  %v87_v37 = vld [vmem:[#allocation2 + $0x60] sm:$0xff]  ;;  %v121_v38 = vld [vmem:[#allocation2 + $0x170] sm:$0xff] }
  0x1a   :  { %191 = vmatpush.msra.mxu2 %v94_v23  ;;  %170 = vmatpush.msra.mxu1 %v127_v26  ;;  %v120_v36 = vld [vmem:[#allocation2 + $0x168] sm:$0xff]  ;;  %v86_v39 = vld [vmem:[#allocation2 + $0x58] sm:$0xff]  ;;  %v85_v41 = vld [vmem:[#allocation2 + $0x50] sm:$0xff] }
  0x1b   :  { %211 = vmatpush.msra.mxu3 %v126_v24  ;;  %151 = vmatpush.msra.mxu0 %v93_v25  ;;  %v118_v40 = vld [vmem:[#allocation2 + $0x158] sm:$0xff]  ;;  %v119_v42 = vld [vmem:[#allocation2 + $0x160] sm:$0xff]  ;;  %v84_v43 = vld [vmem:[#allocation2 + $0x48] sm:$0xff] }
  0x1c   :  { %192 = vmatpush.msra.mxu2 %v92_v27  ;;  %171 = vmatpush.msra.mxu1 %v125_v30  ;;  %v116_v44 = vld [vmem:[#allocation2 + $0x148] sm:$0xff]  ;;  %v83_v45 = vld [vmem:[#allocation2 + $0x40] sm:$0xff]  ;;  %v117_v46 = vld [vmem:[#allocation2 + $0x150] sm:$0xff] }
  0x1d   :  { %212 = vmatpush.msra.mxu3 %v124_v28  ;;  %152 = vmatpush.msra.mxu0 %v91_v29  ;;  %v82_v47 = vld [vmem:[#allocation2 + $0x38] sm:$0xff]  ;;  %v81_v49 = vld [vmem:[#allocation2 + $0x30] sm:$0xff]  ;;  %v115_v50 = vld [vmem:[#allocation2 + $0x140] sm:$0xff] }
  0x1e   :  { %193 = vmatpush.msra.mxu2 %v90_v31  ;;  %172 = vmatpush.msra.mxu1 %v123_v34  ;;  %v114_v48 = vld [vmem:[#allocation2 + $0x138] sm:$0xff]  ;;  %v80_v51 = vld [vmem:[#allocation2 + $0x28] sm:$0xff]  ;;  %v79_v53 = vld [vmem:[#allocation2 + $0x20] sm:$0xff] }
  0x1f   :  { %213 = vmatpush.msra.mxu3 %v122_v32  ;;  %153 = vmatpush.msra.mxu0 %v89_v33  ;;  %v112_v52 = vld [vmem:[#allocation2 + $0x128] sm:$0xff]  ;;  %v113_v54 = vld [vmem:[#allocation2 + $0x130] sm:$0xff]  ;;  %v78_v55 = vld [vmem:[#allocation2 + $0x18] sm:$0xff] }
  0x20   :  { %194 = vmatpush.msra.mxu2 %v88_v35  ;;  %173 = vmatpush.msra.mxu1 %v121_v38  ;;  %v110_v56 = vld [vmem:[#allocation2 + $0x118] sm:$0xff]  ;;  %v77_v57 = vld [vmem:[#allocation2 + $0x10] sm:$0xff]  ;;  %v111_v58 = vld [vmem:[#allocation2 + $0x120] sm:$0xff] }
  0x21   :  { %214 = vmatpush.msra.mxu3 %v120_v36  ;;  %154 = vmatpush.msra.mxu0 %v87_v37  ;;  %v76_v59 = vld [vmem:[#allocation2 + $0x8] sm:$0xff]  ;;  %v73_v61 = vld [vmem:[%s695_s0] sm:$0xff]  ;;  %v109_v0 = vld [vmem:[#allocation2 + $0x110] sm:$0xff] }
  0x22   :  { %195 = vmatpush.msra.mxu2 %v86_v39  ;;  %174 = vmatpush.msra.mxu1 %v119_v42  ;;  %v108_v60 = vld [vmem:[#allocation2 + $0x108] sm:$0xff]  ;;  %v75_v63 = vld [vmem:[#allocation2] sm:$0xff]  ;;  %v258_v1 = vld [vmem:[#allocation4 + $0xf8] sm:$0xff] }
  0x23   :  { %215 = vmatpush.msra.mxu3 %v118_v40  ;;  %155 = vmatpush.msra.mxu0 %v85_v41  ;;  %v74_v62 = vld [vmem:[%s695_s0 + $0x8] sm:$0xff]  ;;  %v107_v2 = vld [vmem:[#allocation2 + $0x100] sm:$0xff]  ;;  %v257_v3 = vld [vmem:[#allocation4 + $0xf0] sm:$0xff] }
  0x24   :  { %196 = vmatpush.msra.mxu2 %v84_v43  ;;  %175 = vmatpush.msra.mxu1 %v117_v46  ;;  %v256_v4 = vld [vmem:[#allocation4 + $0xe8] sm:$0xff]  ;;  %v255_v5 = vld [vmem:[#allocation4 + $0xe0] sm:$0xff]  ;;  %v289_v6 = vld [vmem:[#allocation4 + $0x1f0] sm:$0xff] }
  0x25   :  { %216 = vmatpush.msra.mxu3 %v116_v44  ;;  %156 = vmatpush.msra.mxu0 %v83_v45  ;;  %v290_v7 = vld [vmem:[#allocation4 + $0x1f8] sm:$0xff]  ;;  %v253_v9 = vld [vmem:[#allocation4 + $0xd0] sm:$0xff]  ;;  %v287_v10 = vld [vmem:[#allocation4 + $0x1e0] sm:$0xff] }
  0x26   :  { %197 = vmatpush.msra.mxu2 %v82_v47  ;;  %176 = vmatpush.msra.mxu1 %v115_v50  ;;  %v254_v8 = vld [vmem:[#allocation4 + $0xd8] sm:$0xff]  ;;  %v288_v11 = vld [vmem:[#allocation4 + $0x1e8] sm:$0xff]  ;;  %v251_v13 = vld [vmem:[#allocation4 + $0xc0] sm:$0xff] }
  0x27   :  { %217 = vmatpush.msra.mxu3 %v114_v48  ;;  %157 = vmatpush.msra.mxu0 %v81_v49  ;;  %v252_v12 = vld [vmem:[#allocation4 + $0xc8] sm:$0xff]  ;;  %v285_v14 = vld [vmem:[#allocation4 + $0x1d0] sm:$0xff]  ;;  %v286_v15 = vld [vmem:[#allocation4 + $0x1d8] sm:$0xff] }
  0x28   :  { %198 = vmatpush.msra.mxu2 %v80_v51  ;;  %177 = vmatpush.msra.mxu1 %v113_v54  ;;  %v250_v16 = vld [vmem:[#allocation4 + $0xb8] sm:$0xff]  ;;  %v249_v17 = vld [vmem:[#allocation4 + $0xb0] sm:$0xff]  ;;  %v283_v18 = vld [vmem:[#allocation4 + $0x1c0] sm:$0xff] }
  0x29   :  { %218 = vmatpush.msra.mxu3 %v112_v52  ;;  %158 = vmatpush.msra.mxu0 %v79_v53  ;;  %v284_v19 = vld [vmem:[#allocation4 + $0x1c8] sm:$0xff]  ;;  %v247_v21 = vld [vmem:[#allocation4 + $0xa0] sm:$0xff]  ;;  %v281_v22 = vld [vmem:[#allocation4 + $0x1b0] sm:$0xff] }
  0x2a   :  { %199 = vmatpush.msra.mxu2 %v78_v55  ;;  %178 = vmatpush.msra.mxu1 %v111_v58  ;;  %v248_v20 = vld [vmem:[#allocation4 + $0xa8] sm:$0xff]  ;;  %v282_v23 = vld [vmem:[#allocation4 + $0x1b8] sm:$0xff]  ;;  %v245_v25 = vld [vmem:[#allocation4 + $0x90] sm:$0xff] }
  0x2b   :  { %219 = vmatpush.msra.mxu3 %v110_v56  ;;  %159 = vmatpush.msra.mxu0 %v77_v57  ;;  %v246_v24 = vld [vmem:[#allocation4 + $0x98] sm:$0xff]  ;;  %v279_v26 = vld [vmem:[#allocation4 + $0x1a0] sm:$0xff]  ;;  %v280_v27 = vld [vmem:[#allocation4 + $0x1a8] sm:$0xff] }
  0x2c   :  { %200 = vmatpush.msra.mxu2 %v76_v59  ;;  %179 = vmatpush.msra.mxu1 %v109_v0  ;;  %v244_v28 = vld [vmem:[#allocation4 + $0x88] sm:$0xff]  ;;  %v243_v29 = vld [vmem:[#allocation4 + $0x80] sm:$0xff]  ;;  %v277_v30 = vld [vmem:[#allocation4 + $0x190] sm:$0xff] }
  0x2d   :  { %220 = vmatpush.msra.mxu3 %v108_v60  ;;  %201 = vmatmul.f32.vlgmr.msra.gmra.mxu2 %v73_v61  ;;  %v278_v31 = vld [vmem:[#allocation4 + $0x198] sm:$0xff]  ;;  %v241_v33 = vld [vmem:[#allocation4 + $0x70] sm:$0xff]  ;;  %v275_v34 = vld [vmem:[#allocation4 + $0x180] sm:$0xff] }
  0x2e   :  { %221 = vmatmul.f32.vlgmr.msra.gmra.mxu3 %v74_v62  ;;  %160 = vmatpush.msra.mxu0 %v75_v63  ;;  %v242_v32 = vld [vmem:[#allocation4 + $0x78] sm:$0xff]  ;;  %v276_v35 = vld [vmem:[#allocation4 + $0x188] sm:$0xff]  ;;  %v239_v37 = vld [vmem:[#allocation4 + $0x60] sm:$0xff] }
  0x2f   :  { %161 = vmatmul.f32.vlgmr.msra.gmra.mxu0 %v73_v61  ;;  %337 = vmatpush.msrb.mxu2 %v258_v1  ;;  %v240_v36 = vld [vmem:[#allocation4 + $0x68] sm:$0xff]  ;;  %v273_v38 = vld [vmem:[#allocation4 + $0x170] sm:$0xff]  ;;  %v274_v39 = vld [vmem:[#allocation4 + $0x178] sm:$0xff] }
  0x30   :  { %180 = vmatpush.msra.mxu1 %v107_v2  ;;  %297 = vmatpush.msrb.mxu0 %v257_v3  ;;  %v238_v40 = vld [vmem:[#allocation4 + $0x58] sm:$0xff]  ;;  %v237_v41 = vld [vmem:[#allocation4 + $0x50] sm:$0xff]  ;;  %v271_v42 = vld [vmem:[#allocation4 + $0x160] sm:$0xff] }
  0x31   :  { %181 = vmatmul.f32.vlgmr.msra.gmra.mxu1 %v74_v62  ;;  %338 = vmatpush.msrb.mxu2 %v256_v4  ;;  %v272_v43 = vld [vmem:[#allocation4 + $0x168] sm:$0xff]  ;;  %v235_v45 = vld [vmem:[#allocation4 + $0x40] sm:$0xff]  ;;  %v269_v46 = vld [vmem:[#allocation4 + $0x150] sm:$0xff] }
  0x32   :  { %298 = vmatpush.msrb.mxu0 %v255_v5  ;;  %317 = vmatpush.msrb.mxu1 %v289_v6  ;;  %v236_v44 = vld [vmem:[#allocation4 + $0x48] sm:$0xff]  ;;  %v270_v47 = vld [vmem:[#allocation4 + $0x158] sm:$0xff]  ;;  %v233_v48 = vld [vmem:[#allocation4 + $0x30] sm:$0xff] }
  0x33   :  { %357 = vmatpush.msrb.mxu3 %v290_v7  ;;  %339 = vmatpush.msrb.mxu2 %v254_v8  ;;  %v267_v49 = vld [vmem:[#allocation4 + $0x140] sm:$0xff]  ;;  %v234_v50 = vld [vmem:[#allocation4 + $0x38] sm:$0xff]  ;;  %v268_v51 = vld [vmem:[#allocation4 + $0x148] sm:$0xff] }
  0x34   :  { %299 = vmatpush.msrb.mxu0 %v253_v9  ;;  %318 = vmatpush.msrb.mxu1 %v287_v10  ;;  %v231_v52 = vld [vmem:[#allocation4 + $0x20] sm:$0xff]  ;;  %v265_v53 = vld [vmem:[#allocation4 + $0x130] sm:$0xff]  ;;  %v232_v54 = vld [vmem:[#allocation4 + $0x28] sm:$0xff] }
  0x35   :  { %358 = vmatpush.msrb.mxu3 %v288_v11  ;;  %340 = vmatpush.msrb.mxu2 %v252_v12  ;;  %v266_v55 = vld [vmem:[#allocation4 + $0x138] sm:$0xff]  ;;  %v229_v56 = vld [vmem:[#allocation4 + $0x10] sm:$0xff]  ;;  %v263_v57 = vld [vmem:[#allocation4 + $0x120] sm:$0xff] }
  0x36   :  { %300 = vmatpush.msrb.mxu0 %v251_v13  ;;  %319 = vmatpush.msrb.mxu1 %v285_v14  ;;  %v230_v58 = vld [vmem:[#allocation4 + $0x18] sm:$0xff]  ;;  %v264_v59 = vld [vmem:[#allocation4 + $0x128] sm:$0xff]  ;;  %v227_v60 = vld [vmem:[#allocation4] sm:$0xff] }
  0x37   :  { %359 = vmatpush.msrb.mxu3 %v286_v15  ;;  %341 = vmatpush.msrb.mxu2 %v250_v16  ;;  %v261_v61 = vld [vmem:[#allocation4 + $0x110] sm:$0xff]  ;;  %v228_v62 = vld [vmem:[#allocation4 + $0x8] sm:$0xff]  ;;  %v262_v63 = vld [vmem:[#allocation4 + $0x118] sm:$0xff] }
  0x38   :  { %301 = vmatpush.msrb.mxu0 %v249_v17  ;;  %320 = vmatpush.msrb.mxu1 %v283_v18  ;;  %v259_v0 = vld [vmem:[#allocation4 + $0x100] sm:$0xff]  ;;  %v260_v1 = vld [vmem:[#allocation4 + $0x108] sm:$0xff]  ;;  %v409_v2 = vld [vmem:[#allocation6 + $0xf0] sm:$0xff] }
  0x39   :  { %360 = vmatpush.msrb.mxu3 %v284_v19  ;;  %342 = vmatpush.msrb.mxu2 %v248_v20  ;;  %v410_v3 = vld [vmem:[#allocation6 + $0xf8] sm:$0xff]  ;;  %v407_v4 = vld [vmem:[#allocation6 + $0xe0] sm:$0xff]  ;;  %v408_v5 = vld [vmem:[#allocation6 + $0xe8] sm:$0xff] }
  0x3a   :  { %302 = vmatpush.msrb.mxu0 %v247_v21  ;;  %321 = vmatpush.msrb.mxu1 %v281_v22  ;;  %v405_v6 = vld [vmem:[#allocation6 + $0xd0] sm:$0xff]  ;;  %v406_v7 = vld [vmem:[#allocation6 + $0xd8] sm:$0xff]  ;;  %v439_v10 = vld [vmem:[#allocation6 + $0x1e0] sm:$0xff] }
  0x3b   :  { %361 = vmatpush.msrb.mxu3 %v282_v23  ;;  %343 = vmatpush.msrb.mxu2 %v246_v24  ;;  %v441_v8 = vld [vmem:[#allocation6 + $0x1f0] sm:$0xff]  ;;  %v442_v9 = vld [vmem:[#allocation6 + $0x1f8] sm:$0xff]  ;;  %v403_v11 = vld [vmem:[#allocation6 + $0xc0] sm:$0xff] }
  0x3c   :  { %303 = vmatpush.msrb.mxu0 %v245_v25  ;;  %322 = vmatpush.msrb.mxu1 %v279_v26  ;;  %v404_v12 = vld [vmem:[#allocation6 + $0xc8] sm:$0xff]  ;;  %v437_v14 = vld [vmem:[#allocation6 + $0x1d0] sm:$0xff]  ;;  %v438_v15 = vld [vmem:[#allocation6 + $0x1d8] sm:$0xff] }
  0x3d   :  { %362 = vmatpush.msrb.mxu3 %v280_v27  ;;  %344 = vmatpush.msrb.mxu2 %v244_v28  ;;  %v440_v13 = vld [vmem:[#allocation6 + $0x1e8] sm:$0xff]  ;;  %v401_v16 = vld [vmem:[#allocation6 + $0xb0] sm:$0xff]  ;;  %v402_v17 = vld [vmem:[#allocation6 + $0xb8] sm:$0xff] }
  0x3e   :  { %304 = vmatpush.msrb.mxu0 %v243_v29  ;;  %323 = vmatpush.msrb.mxu1 %v277_v30  ;;  %v435_v18 = vld [vmem:[#allocation6 + $0x1c0] sm:$0xff]  ;;  %v436_v19 = vld [vmem:[#allocation6 + $0x1c8] sm:$0xff]  ;;  %v433_v22 = vld [vmem:[#allocation6 + $0x1b0] sm:$0xff] }
  0x3f   :  { %363 = vmatpush.msrb.mxu3 %v278_v31  ;;  %345 = vmatpush.msrb.mxu2 %v242_v32  ;;  %v399_v20 = vld [vmem:[#allocation6 + $0xa0] sm:$0xff]  ;;  %v400_v21 = vld [vmem:[#allocation6 + $0xa8] sm:$0xff]  ;;  %v434_v23 = vld [vmem:[#allocation6 + $0x1b8] sm:$0xff] }
  0x40   :  { %305 = vmatpush.msrb.mxu0 %v241_v33  ;;  %324 = vmatpush.msrb.mxu1 %v275_v34  ;;  %v397_v24 = vld [vmem:[#allocation6 + $0x90] sm:$0xff]  ;;  %v398_v25 = vld [vmem:[#allocation6 + $0x98] sm:$0xff]  ;;  %v431_v26 = vld [vmem:[#allocation6 + $0x1a0] sm:$0xff] }
  0x41   :  { %364 = vmatpush.msrb.mxu3 %v276_v35  ;;  %346 = vmatpush.msrb.mxu2 %v240_v36  ;;  %v432_v27 = vld [vmem:[#allocation6 + $0x1a8] sm:$0xff]  ;;  %v395_v28 = vld [vmem:[#allocation6 + $0x80] sm:$0xff]  ;;  %v429_v30 = vld [vmem:[#allocation6 + $0x190] sm:$0xff] }
  0x42   :  { %306 = vmatpush.msrb.mxu0 %v239_v37  ;;  %325 = vmatpush.msrb.mxu1 %v273_v38  ;;  %v396_v29 = vld [vmem:[#allocation6 + $0x88] sm:$0xff]  ;;  %v430_v31 = vld [vmem:[#allocation6 + $0x198] sm:$0xff]  ;;  %v393_v32 = vld [vmem:[#allocation6 + $0x70] sm:$0xff] }
  0x43   :  { %365 = vmatpush.msrb.mxu3 %v274_v39  ;;  %347 = vmatpush.msrb.mxu2 %v238_v40  ;;  %v394_v33 = vld [vmem:[#allocation6 + $0x78] sm:$0xff]  ;;  %v139_v34 = vld [vmem:[%s697_s2] sm:$0x3]  ;;  %v428_v36 = vld [vmem:[#allocation6 + $0x188] sm:$0xff] }
  0x44   :  { %307 = vmatpush.msrb.mxu0 %v237_v41  ;;  %326 = vmatpush.msrb.mxu1 %v271_v42  ;;  %v427_v35 = vld [vmem:[#allocation6 + $0x180] sm:$0xff]  ;;  %v392_v38 = vld [vmem:[#allocation6 + $0x68] sm:$0xff]  ;;  %v425_v39 = vld [vmem:[#allocation6 + $0x170] sm:$0xff]  ;;  %v141_v41 = vperm.slane %v139_v34, 0 }
  0x45   :  { %366 = vmatpush.msrb.mxu3 %v272_v43  ;;  %348 = vmatpush.msrb.mxu2 %v236_v44  ;;  %v391_v37 = vld [vmem:[#allocation6 + $0x60] sm:$0xff]  ;;  %v426_v40 = vld [vmem:[#allocation6 + $0x178] sm:$0xff]  ;;  %v389_v42 = vld [vmem:[#allocation6 + $0x50] sm:$0xff] }
  0x46   :  { %308 = vmatpush.msrb.mxu0 %v235_v45  ;;  %327 = vmatpush.msrb.mxu1 %v269_v46  ;;  %v390_v43 = vld [vmem:[#allocation6 + $0x58] sm:$0xff]  ;;  %v387_v44 = vld [vmem:[#allocation6 + $0x40] sm:$0xff]  ;;  %v388_v45 = vld [vmem:[#allocation6 + $0x48] sm:$0xff] }
  0x47   :  { %367 = vmatpush.msrb.mxu3 %v270_v47  ;;  %349 = vmatpush.msrb.mxu2 %v234_v50 }
  0x48   :  { %309 = vmatpush.msrb.mxu0 %v233_v48  ;;  %328 = vmatpush.msrb.mxu1 %v267_v49  ;;  %v142_v48 = vperm.slane %v139_v34, 1 }
  0x49   :  { %368 = vmatpush.msrb.mxu3 %v268_v51  ;;  %350 = vmatpush.msrb.mxu2 %v232_v54 }
  0x4a   :  { %310 = vmatpush.msrb.mxu0 %v231_v52  ;;  %329 = vmatpush.msrb.mxu1 %v265_v53 }
  0x4b   :  { %369 = vmatpush.msrb.mxu3 %v266_v55  ;;  %351 = vmatpush.msrb.mxu2 %v230_v58  ;;  %v423_v58 = vld [vmem:[#allocation6 + $0x160] sm:$0xff] }
  0x4c   :  { %311 = vmatpush.msrb.mxu0 %v229_v56  ;;  %330 = vmatpush.msrb.mxu1 %v263_v57  ;;  %v385_v57 = vld [vmem:[#allocation6 + $0x30] sm:$0xff] }
  0x4d   :  { %370 = vmatpush.msrb.mxu3 %v264_v59  ;;  %352 = vmatpush.msrb.mxu2 %v228_v62  ;;  %v386_v59 = vld [vmem:[#allocation6 + $0x38] sm:$0xff]  ;;  %v421_v62 = vld [vmem:[#allocation6 + $0x150] sm:$0xff] }
  0x4e   :  { %312 = vmatpush.msrb.mxu0 %v227_v60  ;;  %331 = vmatpush.msrb.mxu1 %v261_v61  ;;  %v424_v60 = vld [vmem:[#allocation6 + $0x168] sm:$0xff]  ;;  %v383_v61 = vld [vmem:[#allocation6 + $0x20] sm:$0xff] }
  0x4f   :  { %371 = vmatpush.msrb.mxu3 %v262_v63  ;;  %489 = vmatpush.msra.mxu2 %v410_v3  ;;  %v384_v63 = vld [vmem:[#allocation6 + $0x28] sm:$0xff]  ;;  %v382_v3 = vld [vmem:[#allocation6 + $0x18] sm:$0xff] }
  0x50   :  { %332 = vmatpush.msrb.mxu1 %v259_v0  ;;  %449 = vmatpush.msra.mxu0 %v409_v2  ;;  %v422_v0 = vld [vmem:[#allocation6 + $0x158] sm:$0xff]  ;;  %v419_v2 = vld [vmem:[#allocation6 + $0x140] sm:$0xff] }
  0x51   :  { %372 = vmatpush.msrb.mxu3 %v260_v1  ;;  %490 = vmatpush.msra.mxu2 %v408_v5  ;;  %v381_v1 = vld [vmem:[#allocation6 + $0x10] sm:$0xff]  ;;  %v379_v5 = vld [vmem:[#allocation6] sm:$0xff] }
  0x52   :  { %450 = vmatpush.msra.mxu0 %v407_v4  ;;  %469 = vmatpush.msra.mxu1 %v441_v8  ;;  %v420_v4 = vld [vmem:[#allocation6 + $0x148] sm:$0xff]  ;;  %v418_v8 = vld [vmem:[#allocation6 + $0x138] sm:$0xff] }
  0x53   :  { %509 = vmatpush.msra.mxu3 %v442_v9  ;;  %491 = vmatpush.msra.mxu2 %v406_v7  ;;  %v380_v7 = vld [vmem:[#allocation6 + $0x8] sm:$0xff]  ;;  %v415_v9 = vld [vmem:[#allocation6 + $0x120] sm:$0xff] }
  0x54   :  { %451 = vmatpush.msra.mxu0 %v405_v6  ;;  %470 = vmatpush.msra.mxu1 %v439_v10  ;;  %v417_v6 = vld [vmem:[#allocation6 + $0x130] sm:$0xff]  ;;  %v416_v10 = vld [vmem:[#allocation6 + $0x128] sm:$0xff] }
  0x55   :  { %510 = vmatpush.msra.mxu3 %v440_v13  ;;  %492 = vmatpush.msra.mxu2 %v404_v12  ;;  %v414_v12 = vld [vmem:[#allocation6 + $0x118] sm:$0xff]  ;;  %v411_v13 = vld [vmem:[#allocation6 + $0x100] sm:$0xff] }
  0x56   :  { %452 = vmatpush.msra.mxu0 %v403_v11  ;;  %471 = vmatpush.msra.mxu1 %v437_v14  ;;  %v413_v11 = vld [vmem:[#allocation6 + $0x110] sm:$0xff]  ;;  %v412_v14 = vld [vmem:[#allocation6 + $0x108] sm:$0xff] }
  0x57   :  { %511 = vmatpush.msra.mxu3 %v438_v15  ;;  %493 = vmatpush.msra.mxu2 %v402_v17  ;;  %v291_v15 = vld [vmem:[%s699_s4] sm:$0x3] }
  0x58   :  { %453 = vmatpush.msra.mxu0 %v401_v16  ;;  %472 = vmatpush.msra.mxu1 %v435_v18  ;;  %v293_v16 = vperm.slane %v291_v15, 0 }
  0x59   :  { %512 = vmatpush.msra.mxu3 %v436_v19  ;;  %494 = vmatpush.msra.mxu2 %v400_v21  ;;  %v294_v19 = vperm.slane %v291_v15, 1 }
  0x5a   :  { %454 = vmatpush.msra.mxu0 %v399_v20  ;;  %473 = vmatpush.msra.mxu1 %v433_v22 }
  0x5b   :  { %513 = vmatpush.msra.mxu3 %v434_v23  ;;  %495 = vmatpush.msra.mxu2 %v398_v25 }
  0x5c   :  { %455 = vmatpush.msra.mxu0 %v397_v24  ;;  %474 = vmatpush.msra.mxu1 %v431_v26 }
  0x5d   :  { %514 = vmatpush.msra.mxu3 %v432_v27  ;;  %496 = vmatpush.msra.mxu2 %v396_v29 }
  0x5e   :  { %456 = vmatpush.msra.mxu0 %v395_v28  ;;  %475 = vmatpush.msra.mxu1 %v429_v30  ;;  %v443_v28 = vld [vmem:[%s701_s6] sm:$0x3] }
  0x5f   :  { %515 = vmatpush.msra.mxu3 %v430_v31  ;;  %497 = vmatpush.msra.mxu2 %v394_v33  ;;  %v445_v29 = vperm.slane %v443_v28, 0  ;;  %v446_v34 = vperm.slane %v443_v28, 1 }
  0x60   :  { %457 = vmatpush.msra.mxu0 %v393_v32  ;;  %476 = vmatpush.msra.mxu1 %v427_v35 }
  0x61   :  { %516 = vmatpush.msra.mxu3 %v428_v36  ;;  %498 = vmatpush.msra.mxu2 %v392_v38 }
  0x62   :  { %458 = vmatpush.msra.mxu0 %v391_v37  ;;  %477 = vmatpush.msra.mxu1 %v425_v39 }
  0x63   :  { %517 = vmatpush.msra.mxu3 %v426_v40  ;;  %499 = vmatpush.msra.mxu2 %v390_v43 }
  0x64   :  { %459 = vmatpush.msra.mxu0 %v389_v42  ;;  %478 = vmatpush.msra.mxu1 %v423_v58 }
  0x65   :  { %500 = vmatpush.msra.mxu2 %v388_v45  ;;  %518 = vmatpush.msra.mxu3 %v424_v60 }
  0x66   :  { %460 = vmatpush.msra.mxu0 %v387_v44  ;;  %479 = vmatpush.msra.mxu1 %v421_v62 }
  0x67   :  { %501 = vmatpush.msra.mxu2 %v386_v59  ;;  %519 = vmatpush.msra.mxu3 %v422_v0 }
  0x68   :  { %461 = vmatpush.msra.mxu0 %v385_v57  ;;  %480 = vmatpush.msra.mxu1 %v419_v2 }
  0x69   :  { %502 = vmatpush.msra.mxu2 %v384_v63  ;;  %520 = vmatpush.msra.mxu3 %v420_v4 }
  0x6a   :  { %462 = vmatpush.msra.mxu0 %v383_v61  ;;  %481 = vmatpush.msra.mxu1 %v417_v6 }
  0x6b   :  { %503 = vmatpush.msra.mxu2 %v382_v3  ;;  %521 = vmatpush.msra.mxu3 %v418_v8 }
  0x6c   :  { %463 = vmatpush.msra.mxu0 %v381_v1  ;;  %482 = vmatpush.msra.mxu1 %v415_v9 }
  0x6d   :  { %504 = vmatpush.msra.mxu2 %v380_v7  ;;  %522 = vmatpush.msra.mxu3 %v416_v10 }
  0x6e   :  { %464 = vmatpush.msra.mxu0 %v379_v5  ;;  %483 = vmatpush.msra.mxu1 %v413_v11 }
  0x6f   :  { %523 = vmatpush.msra.mxu3 %v414_v12 }
  0x70   :  { %484 = vmatpush.msra.mxu1 %v411_v13 }
  0x71   :  { %524 = vmatpush.msra.mxu3 %v412_v14 }
  0xac   :  { %v162_v46 = vpop.f32.mrf.mxu0 }
  0xad   :  { %v163_v47 = vadd.f32 %v162_v46, %v141_v41 }
  0xae   :  { %v182_v49 = vpop.f32.mrf.mxu1 }
  0xaf   :  { %v183_v50 = vadd.f32 %v182_v49, %v163_v47 }
  0xb0   :  { %v202_v51 = vpop.f32.mrf.mxu2 }
  0xb1   :  { %v222_v52 = vpop.f32.mrf.mxu3  ;;  %v225_v53 = vmax.f32 %v183_v50, 0.0  ;;  %v203_v54 = vadd.f32 %v202_v51, %v142_v48 }
  0xb3   :  { %v223_v55 = vadd.f32 %v222_v52, %v203_v54  ;;  %313 = vmatmul.f32.vlgmr.msrb.gmra.mxu0 %v225_v53  ;;  %353 = vmatmul.f32.vlgmr.msrb.gmra.mxu2 %v225_v53 }
  0xb5   :  { %v226_v56 = vmax.f32 %v223_v55, 0.0 }
  0xb7   :  { %333 = vmatmul.f32.vlgmr.msrb.gmra.mxu1 %v226_v56  ;;  %373 = vmatmul.f32.vlgmr.msrb.gmra.mxu3 %v226_v56 }
 0x130   :  { %v314_v17 = vpop.f32.mrf.mxu0 }
 0x131   :  { %v315_v18 = vadd.f32 %v314_v17, %v293_v16 }
 0x134   :  { %v334_v20 = vpop.f32.mrf.mxu1 }
 0x135   :  { %v335_v21 = vadd.f32 %v334_v20, %v315_v18 }
 0x136   :  { %v354_v22 = vpop.f32.mrf.mxu2 }
 0x137   :  { %v377_v23 = vmax.f32 %v335_v21, 0.0  ;;  %v355_v24 = vadd.f32 %v354_v22, %v294_v19 }
 0x139   :  { %465 = vmatmul.f32.vlgmr.msra.gmra.mxu0 %v377_v23  ;;  %505 = vmatmul.f32.vlgmr.msra.gmra.mxu2 %v377_v23 }
 0x13a   :  { %v374_v25 = vpop.f32.mrf.mxu3 }
 0x13b   :  { %v375_v26 = vadd.f32 %v374_v25, %v355_v24 }
 0x13d   :  { %v378_v27 = vmax.f32 %v375_v26, 0.0 }
 0x13f   :  { %485 = vmatmul.f32.vlgmr.msra.gmra.mxu1 %v378_v27  ;;  %525 = vmatmul.f32.vlgmr.msra.gmra.mxu3 %v378_v27 }
 0x1b6   :  { %v466_v30 = vpop.f32.mrf.mxu0 }
 0x1b7   :  { %v467_v31 = vadd.f32 %v466_v30, %v445_v29 }
 0x1bc   :  { %v486_v32 = vpop.f32.mrf.mxu1  ;;  %v506_v35 = vpop.f32.mrf.mxu2 }
 0x1bd   :  { %v487_v33 = vadd.f32 %v486_v32, %v467_v31  ;;  %v507_v37 = vadd.f32 %v506_v35, %v446_v34 }
 0x1bf   :  { %v529_v36 = vmax.f32 %v487_v33, 0.0 }
 0x1c1   :  { %531 = vst [vmem:[%s702_s7] sm:$0xff] %v529_v36 }
 0x1c2   :  { %v526_v38 = vpop.f32.mrf.mxu3 }
 0x1c3   :  { %v527_v39 = vadd.f32 %v526_v38, %v507_v37 }
 0x1c5   :  { %v530_v40 = vmax.f32 %v527_v39, 0.0 }
 0x1c7   :  { %532 = vst [vmem:[%s702_s7 + $0x8] sm:$0xff] %v530_v40 }
 0x1c8   :  { %537 = vsyncpa [#allocation3], 1 }
 0x1c9   :  { %538 = vsyncpa [#allocation5], 1 }

</bundles_post_ra>
